<compile_context>
chip_gen: v6e
topology: v6e:2x2x1
jax: 0.10.0
libtpu: 0.0.40
codegen_flags: <defaults>
</compile_context>

<pallas_src>
import jax
import jax.numpy as jnp
from jax.experimental import pallas as pl
from jax.experimental.pallas import tpu as pltpu

E = 32            # embedding dim / LSTM input size
H = 64            # LSTM hidden size per direction
VOCAB = 64
NUM_CLASSES = 26
OUT_PAD = 128     # lane-dense padded output width
UNROLL_T_MAX = 16 # full Python unroll up to this T; fori_loop(unroll=2) beyond


def _round_up(a, b):
    return (a + b - 1) // b * b


def _bilstm_head_kernel(x_ref,      # (T, BT, E)   embedded sequence (batch tile)
                        winf_ref,   # (E, 4H)      fwd input proj   (g cols pre-scaled x2)
                        binf_ref,   # (1, 4H)      fwd b_ih + b_hh  (g cols pre-scaled x2)
                        whh_ref,    # (H, 4H)      fwd recurrent W  (g cols pre-scaled x2)
                        winb_ref,   # (E, 4H)      bwd input proj   (g cols pre-scaled x2)
                        binb_ref,   # (1, 4H)      bwd b_ih + b_hh  (g cols pre-scaled x2)
                        wout_ref,   # (2H, OUT_PAD)
                        bout_ref,   # (1, OUT_PAD)
                        o_ref):     # (BT, OUT_PAD)
    T, BT, _ = x_ref.shape
    BT2 = BT // 2
    mm_dt = whh_ref.dtype          # matmul operand dtype (f32 or bf16)

    x_all = x_ref[...]                                            # (T, BT, E)

    # ---- hoisted FORWARD input projection: one (T*BT, E) @ (E, 4H) MXU call ----
    z_fwd = (jnp.dot(x_all.reshape(T * BT, E), winf_ref[...],
                     preferred_element_type=jnp.float32)
             + binf_ref[...]).reshape(T, BT, 4 * H)               # f32

    whh = whh_ref[...]                                            # (H, 4H)

    def gates(z):
        # g columns pre-scaled by 2 in the wrapper: tanh(zg) == 2*sigmoid(2*zg) - 1,
        # so ONE sigmoid pass over all 4H lanes covers i, f, g, o.
        s = jax.nn.sigmoid(z)
        return (s[:, 0:H], s[:, H:2 * H],
                2.0 * s[:, 2 * H:3 * H] - 1.0, s[:, 3 * H:4 * H])

    def step(z_t, h1, c1, h2, c2):
        # Two independent half-tile chains interleaved inside one time step:
        # chain B's gate math overlaps chain A's h@W_hh push/drain and vice versa.
        za = z_t[:BT2] + jnp.dot(h1.astype(mm_dt), whh,
                                 preferred_element_type=jnp.float32)
        zb = z_t[BT2:] + jnp.dot(h2.astype(mm_dt), whh,
                                 preferred_element_type=jnp.float32)
        i1, f1, g1, o1 = gates(za)
        i2, f2, g2, o2 = gates(zb)
        c1 = f1 * c1 + i1 * g1
        c2 = f2 * c2 + i2 * g2
        h1 = o1 * jnp.tanh(c1)
        h2 = o2 * jnp.tanh(c2)
        return h1, c1, h2, c2

    zero = jnp.zeros((BT2, H), jnp.float32)
    carry = (zero, zero, zero, zero)
    if T <= UNROLL_T_MAX:
        for t in range(T):                                        # fully unrolled (static T)
            carry = step(z_fwd[t], *carry)
    else:
        carry = jax.lax.fori_loop(0, T, lambda t, c: step(z_fwd[t], *c),
                                  carry, unroll=2)
    h1, _c1, h2, _c2 = carry
    h_fwd = jnp.concatenate([h1, h2], axis=0)                     # (BT, H)

    # ---- backward direction: output[:, -1, H:] is its FIRST step (h0 = c0 = 0),
    #      so c = i*g, h = o*tanh(i*g); no h @ W_hh_b matmul exists at all. ----
    z_b = (jnp.dot(x_all[T - 1], winb_ref[...], preferred_element_type=jnp.float32)
           + binb_ref[...])                                       # (BT, 4H)
    ib, _fb, gb, ob = gates(z_b)
    h_bwd = ob * jnp.tanh(ib * gb)

    # ---- final Linear(128, 26), lane-dense (padded to 128 output columns) ----
    feat = jnp.concatenate([h_fwd, h_bwd], axis=-1).astype(mm_dt)  # (BT, 2H) = 128 lanes
    logits = (jnp.dot(feat, wout_ref[...], preferred_element_type=jnp.float32)
              + bout_ref[...])
    o_ref[...] = logits.astype(o_ref.dtype)


def init_params(key):
    """Deterministic synthetic parameters with the shapes from NeuralNetwork.__init__."""
    ks = jax.random.split(key, 12)
    u = lambda k, shape, s: jax.random.uniform(k, shape, jnp.float32, -s, s)
    bound = 1.0 / jnp.sqrt(jnp.float32(H))
    return {
        "emb": jax.random.normal(ks[0], (VOCAB, E), jnp.float32),      # Embedding(64, 32)
        # forward direction LSTM weights (PyTorch shapes)
        "w_ih_f": u(ks[1], (4 * H, E), bound),
        "w_hh_f": u(ks[2], (4 * H, H), bound),
        "b_ih_f": u(ks[3], (4 * H,), bound),
        "b_hh_f": u(ks[4], (4 * H,), bound),
        # reverse direction LSTM weights
        "w_ih_b": u(ks[5], (4 * H, E), bound),
        "w_hh_b": u(ks[6], (4 * H, H), bound),
        "b_ih_b": u(ks[7], (4 * H,), bound),
        "b_hh_b": u(ks[8], (4 * H,), bound),
        # Linear(128, 26)
        "w_out": u(ks[9], (NUM_CLASSES, 2 * H), 1.0 / jnp.sqrt(jnp.float32(2 * H))),
        "b_out": u(ks[10], (NUM_CLASSES,), 1.0 / jnp.sqrt(jnp.float32(2 * H))),
    }


def _choose_batch_tile(B, T):
    # Cap the hoisted z scratch (T*BT*4H*4 B) at ~8 MiB so the whole kernel sits
    # comfortably under the 16 MiB (v5e) / 32 MiB (v6e, v7x) scoped-VMEM defaults.
    cap_vmem = max(16, ((8 * 1024 * 1024) // (T * 4 * H * 4)) // 16 * 16)
    # Split the batch roughly in half so the "parallel" grid has >= 2 tiles
    # (v7x megacore); keep tiles <= 256 rows (v6e MXU fill vs grid-step overhead).
    want = _round_up(max((B + 1) // 2, 16), 16)
    return max(16, min(256, cap_vmem, want))


def neural_network_forward(x_ids, params, *, batch_tile=None, param_dtype=jnp.float32):
    """x_ids: (B, T) int32 token ids in [0, 64). Returns (B, 26) float32 logits."""
    B, T = x_ids.shape

    # --- glue: embedding lookup with max_norm=1 renorm (matches nn.Embedding max_norm) ---
    emb = params["emb"]
    norms = jnp.linalg.norm(emb, axis=1, keepdims=True)
    emb = emb * jnp.minimum(1.0, 1.0 / jnp.maximum(norms, 1e-7))
    x_emb = emb[x_ids]                                            # (B, T, E)
    x_tbe = jnp.transpose(x_emb, (1, 0, 2)).astype(param_dtype)   # layout: (T, B, E)

    # --- batch tiling: tiles are a multiple of 16 (two interleaved >=8-row chains) ---
    if batch_tile is None:
        batch_tile = _choose_batch_tile(B, T)
    batch_tile = max(16, _round_up(batch_tile, 16))
    b_pad = _round_up(B, batch_tile)
    if b_pad != B:
        x_tbe = jnp.pad(x_tbe, ((0, 0), (0, b_pad - B), (0, 0)))
    n_tiles = b_pad // batch_tile

    # --- glue: transpose/fuse weights; pre-scale g-gate columns by 2 so the kernel can
    #     use tanh(x) = 2*sigmoid(2x) - 1 with a single sigmoid pass over all gates ---
    gscale = jnp.ones((4 * H,), jnp.float32).at[2 * H:3 * H].set(2.0)
    w_in_f = (params["w_ih_f"].T * gscale[None, :]).astype(param_dtype)        # (E, 4H)
    b_in_f = ((params["b_ih_f"] + params["b_hh_f"]) * gscale).reshape(1, 4 * H)
    w_hh_f = (params["w_hh_f"].T * gscale[None, :]).astype(param_dtype)        # (H, 4H)
    w_in_b = (params["w_ih_b"].T * gscale[None, :]).astype(param_dtype)        # (E, 4H)
    b_in_b = ((params["b_ih_b"] + params["b_hh_b"]) * gscale).reshape(1, 4 * H)
    # lane-dense output head: pad 26 -> 128 columns with zeros
    w_out = jnp.zeros((2 * H, OUT_PAD), jnp.float32).at[:, :NUM_CLASSES].set(
        params["w_out"].T).astype(param_dtype)
    b_out = jnp.zeros((1, OUT_PAD), jnp.float32).at[:, :NUM_CLASSES].set(params["b_out"])

    full = lambda arr: pl.BlockSpec(arr.shape, lambda b: (0,) * arr.ndim)  # replicated

    out = pl.pallas_call(
        _bilstm_head_kernel,
        out_shape=jax.ShapeDtypeStruct((b_pad, OUT_PAD), jnp.float32),
        grid=(n_tiles,),
        in_specs=[
            pl.BlockSpec((T, batch_tile, E), lambda b: (0, b, 0)),   # x, tiled over batch
            full(w_in_f), full(b_in_f), full(w_hh_f),
            full(w_in_b), full(b_in_b), full(w_out), full(b_out),
        ],
        out_specs=pl.BlockSpec((batch_tile, OUT_PAD), lambda b: (b, 0)),
        compiler_params=pltpu.CompilerParams(
            dimension_semantics=("parallel",),
            vmem_limit_bytes=32 * 1024 * 1024),      # raises v5e's 16 MiB default
    )(x_tbe, w_in_f, b_in_f, w_hh_f, w_in_b, b_in_b, w_out, b_out)

    return out[:B, :NUM_CLASSES]


def _reference_forward(x_ids, params):
    """Pure-JAX reference (same math as the PyTorch forward) for a correctness check."""
    emb = params["emb"]
    norms = jnp.linalg.norm(emb, axis=1, keepdims=True)
    emb = emb * jnp.minimum(1.0, 1.0 / jnp.maximum(norms, 1e-7))
    x_emb = emb[x_ids]                                            # (B, T, E)
    B, T, _ = x_emb.shape

    def cell(x_t, h, c, wih, whh, bih, bhh):
        z = x_t @ wih.T + bih + h @ whh.T + bhh
        i = jax.nn.sigmoid(z[:, 0:H]); f = jax.nn.sigmoid(z[:, H:2 * H])
        g = jnp.tanh(z[:, 2 * H:3 * H]); o = jax.nn.sigmoid(z[:, 3 * H:4 * H])
        c = f * c + i * g
        return o * jnp.tanh(c), c

    h = jnp.zeros((B, H)); c = jnp.zeros((B, H))
    for t in range(T):
        h, c = cell(x_emb[:, t], h, c, params["w_ih_f"], params["w_hh_f"],
                    params["b_ih_f"], params["b_hh_f"])
    hb, _ = cell(x_emb[:, T - 1], jnp.zeros((B, H)), jnp.zeros((B, H)),
                 params["w_ih_b"], params["w_hh_b"], params["b_ih_b"], params["b_hh_b"])
    feat = jnp.concatenate([h, hb], axis=-1)
    return feat @ params["w_out"].T + params["b_out"]


if __name__ == "__main__":
    key = jax.random.PRNGKey(0)
    pkey, xkey = jax.random.split(key)
    params = init_params(pkey)

    B, T = 2, 8
    x_ids = jax.random.randint(xkey, (B, T), 0, VOCAB, dtype=jnp.int32)

    logits = neural_network_forward(x_ids, params)
    logits = jax.block_until_ready(logits)

    ref = _reference_forward(x_ids, params)
    assert logits.shape == (B, NUM_CLASSES)
    assert jnp.allclose(logits, ref, atol=1e-4, rtol=1e-4), "mismatch vs reference"

    print("KERNEL_OK")
</pallas_src>

<mosaic_0001>
module attributes {stable_mosaic.version = 11 : i64} {
  func.func @_bilstm_head_kernel(%arg0: i32, %arg1: memref<8x16x32xf32, #tpu.memory_space<vmem>>, %arg2: memref<32x256xf32, #tpu.memory_space<vmem>>, %arg3: memref<1x256xf32, #tpu.memory_space<vmem>>, %arg4: memref<64x256xf32, #tpu.memory_space<vmem>>, %arg5: memref<32x256xf32, #tpu.memory_space<vmem>>, %arg6: memref<1x256xf32, #tpu.memory_space<vmem>>, %arg7: memref<128x128xf32, #tpu.memory_space<vmem>>, %arg8: memref<1x128xf32, #tpu.memory_space<vmem>>, %arg9: memref<16x128xf32, #tpu.memory_space<vmem>>) attributes {dimension_semantics = [#tpu.dimension_semantics<parallel>], iteration_bounds = array<i64: 1>, scalar_prefetch = 0 : i64, scratch_operands = 0 : i64, tpu.core_type = #tpu.core_type<tc>, window_params = [{transform_indices = @transform_0, window_bounds = array<i64: 8, 16, 32>}, {pipeline_mode = #tpu.pipeline_mode<synchronous>, transform_indices = @transform_1, window_bounds = array<i64: 32, 256>}, {pipeline_mode = #tpu.pipeline_mode<synchronous>, transform_indices = @transform_2, window_bounds = array<i64: 1, 256>}, {pipeline_mode = #tpu.pipeline_mode<synchronous>, transform_indices = @transform_3, window_bounds = array<i64: 64, 256>}, {pipeline_mode = #tpu.pipeline_mode<synchronous>, transform_indices = @transform_4, window_bounds = array<i64: 32, 256>}, {pipeline_mode = #tpu.pipeline_mode<synchronous>, transform_indices = @transform_5, window_bounds = array<i64: 1, 256>}, {pipeline_mode = #tpu.pipeline_mode<synchronous>, transform_indices = @transform_6, window_bounds = array<i64: 128, 128>}, {pipeline_mode = #tpu.pipeline_mode<synchronous>, transform_indices = @transform_7, window_bounds = array<i64: 1, 128>}, {transform_indices = @transform_8, window_bounds = array<i64: 16, 128>}]} {
    %c0 = arith.constant 0 : index
    %c0_0 = arith.constant 0 : index
    %c0_1 = arith.constant 0 : index
    %0 = vector.load %arg1[%c0, %c0_0, %c0_1] : memref<8x16x32xf32, #tpu.memory_space<vmem>>, vector<8x16x32xf32>
    %1 = vector.shape_cast %0 : vector<8x16x32xf32> to vector<128x32xf32>
    %c0_2 = arith.constant 0 : index
    %c0_3 = arith.constant 0 : index
    %2 = vector.load %arg2[%c0_2, %c0_3] : memref<32x256xf32, #tpu.memory_space<vmem>>, vector<32x256xf32>
    %cst = arith.constant dense<0.000000e+00> : vector<128x256xf32>
    %3 = tpu.matmul %1, %2, %cst {dimension_numbers = #tpu.dot_dimension_numbers<[1], [0], [0], [1], [0, 0, 1, 1], [], []>} : vector<128x32xf32>, vector<32x256xf32>, vector<128x256xf32> -> vector<128x256xf32>
    %c0_4 = arith.constant 0 : index
    %c0_5 = arith.constant 0 : index
    %4 = vector.load %arg3[%c0_4, %c0_5] : memref<1x256xf32, #tpu.memory_space<vmem>>, vector<1x256xf32>
    %5 = vector.broadcast %4 : vector<1x256xf32> to vector<128x256xf32>
    %6 = arith.addf %3, %5 : vector<128x256xf32>
    %7 = vector.shape_cast %6 : vector<128x256xf32> to vector<8x16x256xf32>
    %c0_6 = arith.constant 0 : index
    %c0_7 = arith.constant 0 : index
    %8 = vector.load %arg4[%c0_6, %c0_7] : memref<64x256xf32, #tpu.memory_space<vmem>>, vector<64x256xf32>
    %cst_8 = arith.constant 0.000000e+00 : f32
    %9 = vector.broadcast %cst_8 : f32 to vector<8x64xf32>
    %10 = vector.extract_strided_slice %7 {offsets = [0, 0, 0], sizes = [1, 16, 256], strides = [1, 1, 1]} : vector<8x16x256xf32> to vector<1x16x256xf32>
    %11 = vector.shape_cast %10 : vector<1x16x256xf32> to vector<16x256xf32>
    %12 = vector.extract_strided_slice %11 {offsets = [0, 0], sizes = [8, 256], strides = [1, 1]} : vector<16x256xf32> to vector<8x256xf32>
    %cst_9 = arith.constant dense<0.000000e+00> : vector<8x256xf32>
    %13 = tpu.matmul %9, %8, %cst_9 {dimension_numbers = #tpu.dot_dimension_numbers<[1], [0], [0], [1], [0, 0, 1, 1], [], []>} : vector<8x64xf32>, vector<64x256xf32>, vector<8x256xf32> -> vector<8x256xf32>
    %14 = arith.addf %12, %13 : vector<8x256xf32>
    %15 = vector.extract_strided_slice %11 {offsets = [8, 0], sizes = [8, 256], strides = [1, 1]} : vector<16x256xf32> to vector<8x256xf32>
    %cst_10 = arith.constant dense<0.000000e+00> : vector<8x256xf32>
    %16 = tpu.matmul %9, %8, %cst_10 {dimension_numbers = #tpu.dot_dimension_numbers<[1], [0], [0], [1], [0, 0, 1, 1], [], []>} : vector<8x64xf32>, vector<64x256xf32>, vector<8x256xf32> -> vector<8x256xf32>
    %17 = arith.addf %15, %16 : vector<8x256xf32>
    %18 = arith.negf %14 : vector<8x256xf32>
    %19 = math.exp %18 : vector<8x256xf32>
    %cst_11 = arith.constant 1.000000e+00 : f32
    %20 = vector.broadcast %cst_11 : f32 to vector<8x256xf32>
    %21 = arith.addf %20, %19 : vector<8x256xf32>
    %22 = arith.divf %20, %21 : vector<8x256xf32>
    %23 = vector.extract_strided_slice %22 {offsets = [0, 0], sizes = [8, 64], strides = [1, 1]} : vector<8x256xf32> to vector<8x64xf32>
    %24 = vector.extract_strided_slice %22 {offsets = [0, 64], sizes = [8, 64], strides = [1, 1]} : vector<8x256xf32> to vector<8x64xf32>
    %25 = vector.extract_strided_slice %22 {offsets = [0, 128], sizes = [8, 64], strides = [1, 1]} : vector<8x256xf32> to vector<8x64xf32>
    %cst_12 = arith.constant 2.000000e+00 : f32
    %26 = vector.broadcast %cst_12 : f32 to vector<8x64xf32>
    %27 = arith.mulf %26, %25 : vector<8x64xf32>
    %cst_13 = arith.constant 1.000000e+00 : f32
    %28 = vector.broadcast %cst_13 : f32 to vector<8x64xf32>
    %29 = arith.subf %27, %28 : vector<8x64xf32>
    %30 = vector.extract_strided_slice %22 {offsets = [0, 192], sizes = [8, 64], strides = [1, 1]} : vector<8x256xf32> to vector<8x64xf32>
    %31 = arith.negf %17 : vector<8x256xf32>
    %32 = math.exp %31 : vector<8x256xf32>
    %cst_14 = arith.constant 1.000000e+00 : f32
    %33 = vector.broadcast %cst_14 : f32 to vector<8x256xf32>
    %34 = arith.addf %33, %32 : vector<8x256xf32>
    %35 = arith.divf %33, %34 : vector<8x256xf32>
    %36 = vector.extract_strided_slice %35 {offsets = [0, 0], sizes = [8, 64], strides = [1, 1]} : vector<8x256xf32> to vector<8x64xf32>
    %37 = vector.extract_strided_slice %35 {offsets = [0, 64], sizes = [8, 64], strides = [1, 1]} : vector<8x256xf32> to vector<8x64xf32>
    %38 = vector.extract_strided_slice %35 {offsets = [0, 128], sizes = [8, 64], strides = [1, 1]} : vector<8x256xf32> to vector<8x64xf32>
    %cst_15 = arith.constant 2.000000e+00 : f32
    %39 = vector.broadcast %cst_15 : f32 to vector<8x64xf32>
    %40 = arith.mulf %39, %38 : vector<8x64xf32>
    %cst_16 = arith.constant 1.000000e+00 : f32
    %41 = vector.broadcast %cst_16 : f32 to vector<8x64xf32>
    %42 = arith.subf %40, %41 : vector<8x64xf32>
    %43 = vector.extract_strided_slice %35 {offsets = [0, 192], sizes = [8, 64], strides = [1, 1]} : vector<8x256xf32> to vector<8x64xf32>
    %44 = arith.mulf %24, %9 : vector<8x64xf32>
    %45 = arith.mulf %23, %29 : vector<8x64xf32>
    %46 = arith.addf %44, %45 : vector<8x64xf32>
    %47 = arith.mulf %37, %9 : vector<8x64xf32>
    %48 = arith.mulf %36, %42 : vector<8x64xf32>
    %49 = arith.addf %47, %48 : vector<8x64xf32>
    %50 = math.tanh %46 : vector<8x64xf32>
    %51 = arith.mulf %30, %50 : vector<8x64xf32>
    %52 = math.tanh %49 : vector<8x64xf32>
    %53 = arith.mulf %43, %52 : vector<8x64xf32>
    %54 = vector.extract_strided_slice %7 {offsets = [1, 0, 0], sizes = [1, 16, 256], strides = [1, 1, 1]} : vector<8x16x256xf32> to vector<1x16x256xf32>
    %55 = vector.shape_cast %54 : vector<1x16x256xf32> to vector<16x256xf32>
    %56 = vector.extract_strided_slice %55 {offsets = [0, 0], sizes = [8, 256], strides = [1, 1]} : vector<16x256xf32> to vector<8x256xf32>
    %cst_17 = arith.constant dense<0.000000e+00> : vector<8x256xf32>
    %57 = tpu.matmul %51, %8, %cst_17 {dimension_numbers = #tpu.dot_dimension_numbers<[1], [0], [0], [1], [0, 0, 1, 1], [], []>} : vector<8x64xf32>, vector<64x256xf32>, vector<8x256xf32> -> vector<8x256xf32>
    %58 = arith.addf %56, %57 : vector<8x256xf32>
    %59 = vector.extract_strided_slice %55 {offsets = [8, 0], sizes = [8, 256], strides = [1, 1]} : vector<16x256xf32> to vector<8x256xf32>
    %cst_18 = arith.constant dense<0.000000e+00> : vector<8x256xf32>
    %60 = tpu.matmul %53, %8, %cst_18 {dimension_numbers = #tpu.dot_dimension_numbers<[1], [0], [0], [1], [0, 0, 1, 1], [], []>} : vector<8x64xf32>, vector<64x256xf32>, vector<8x256xf32> -> vector<8x256xf32>
    %61 = arith.addf %59, %60 : vector<8x256xf32>
    %62 = arith.negf %58 : vector<8x256xf32>
    %63 = math.exp %62 : vector<8x256xf32>
    %cst_19 = arith.constant 1.000000e+00 : f32
    %64 = vector.broadcast %cst_19 : f32 to vector<8x256xf32>
    %65 = arith.addf %64, %63 : vector<8x256xf32>
    %66 = arith.divf %64, %65 : vector<8x256xf32>
    %67 = vector.extract_strided_slice %66 {offsets = [0, 0], sizes = [8, 64], strides = [1, 1]} : vector<8x256xf32> to vector<8x64xf32>
    %68 = vector.extract_strided_slice %66 {offsets = [0, 64], sizes = [8, 64], strides = [1, 1]} : vector<8x256xf32> to vector<8x64xf32>
    %69 = vector.extract_strided_slice %66 {offsets = [0, 128], sizes = [8, 64], strides = [1, 1]} : vector<8x256xf32> to vector<8x64xf32>
    %cst_20 = arith.constant 2.000000e+00 : f32
    %70 = vector.broadcast %cst_20 : f32 to vector<8x64xf32>
    %71 = arith.mulf %70, %69 : vector<8x64xf32>
    %cst_21 = arith.constant 1.000000e+00 : f32
    %72 = vector.broadcast %cst_21 : f32 to vector<8x64xf32>
    %73 = arith.subf %71, %72 : vector<8x64xf32>
    %74 = vector.extract_strided_slice %66 {offsets = [0, 192], sizes = [8, 64], strides = [1, 1]} : vector<8x256xf32> to vector<8x64xf32>
    %75 = arith.negf %61 : vector<8x256xf32>
    %76 = math.exp %75 : vector<8x256xf32>
    %cst_22 = arith.constant 1.000000e+00 : f32
    %77 = vector.broadcast %cst_22 : f32 to vector<8x256xf32>
    %78 = arith.addf %77, %76 : vector<8x256xf32>
    %79 = arith.divf %77, %78 : vector<8x256xf32>
    %80 = vector.extract_strided_slice %79 {offsets = [0, 0], sizes = [8, 64], strides = [1, 1]} : vector<8x256xf32> to vector<8x64xf32>
    %81 = vector.extract_strided_slice %79 {offsets = [0, 64], sizes = [8, 64], strides = [1, 1]} : vector<8x256xf32> to vector<8x64xf32>
    %82 = vector.extract_strided_slice %79 {offsets = [0, 128], sizes = [8, 64], strides = [1, 1]} : vector<8x256xf32> to vector<8x64xf32>
    %cst_23 = arith.constant 2.000000e+00 : f32
    %83 = vector.broadcast %cst_23 : f32 to vector<8x64xf32>
    %84 = arith.mulf %83, %82 : vector<8x64xf32>
    %cst_24 = arith.constant 1.000000e+00 : f32
    %85 = vector.broadcast %cst_24 : f32 to vector<8x64xf32>
    %86 = arith.subf %84, %85 : vector<8x64xf32>
    %87 = vector.extract_strided_slice %79 {offsets = [0, 192], sizes = [8, 64], strides = [1, 1]} : vector<8x256xf32> to vector<8x64xf32>
    %88 = arith.mulf %68, %46 : vector<8x64xf32>
    %89 = arith.mulf %67, %73 : vector<8x64xf32>
    %90 = arith.addf %88, %89 : vector<8x64xf32>
    %91 = arith.mulf %81, %49 : vector<8x64xf32>
    %92 = arith.mulf %80, %86 : vector<8x64xf32>
    %93 = arith.addf %91, %92 : vector<8x64xf32>
    %94 = math.tanh %90 : vector<8x64xf32>
    %95 = arith.mulf %74, %94 : vector<8x64xf32>
    %96 = math.tanh %93 : vector<8x64xf32>
    %97 = arith.mulf %87, %96 : vector<8x64xf32>
    %98 = vector.extract_strided_slice %7 {offsets = [2, 0, 0], sizes = [1, 16, 256], strides = [1, 1, 1]} : vector<8x16x256xf32> to vector<1x16x256xf32>
    %99 = vector.shape_cast %98 : vector<1x16x256xf32> to vector<16x256xf32>
    %100 = vector.extract_strided_slice %99 {offsets = [0, 0], sizes = [8, 256], strides = [1, 1]} : vector<16x256xf32> to vector<8x256xf32>
    %cst_25 = arith.constant dense<0.000000e+00> : vector<8x256xf32>
    %101 = tpu.matmul %95, %8, %cst_25 {dimension_numbers = #tpu.dot_dimension_numbers<[1], [0], [0], [1], [0, 0, 1, 1], [], []>} : vector<8x64xf32>, vector<64x256xf32>, vector<8x256xf32> -> vector<8x256xf32>
    %102 = arith.addf %100, %101 : vector<8x256xf32>
    %103 = vector.extract_strided_slice %99 {offsets = [8, 0], sizes = [8, 256], strides = [1, 1]} : vector<16x256xf32> to vector<8x256xf32>
    %cst_26 = arith.constant dense<0.000000e+00> : vector<8x256xf32>
    %104 = tpu.matmul %97, %8, %cst_26 {dimension_numbers = #tpu.dot_dimension_numbers<[1], [0], [0], [1], [0, 0, 1, 1], [], []>} : vector<8x64xf32>, vector<64x256xf32>, vector<8x256xf32> -> vector<8x256xf32>
    %105 = arith.addf %103, %104 : vector<8x256xf32>
    %106 = arith.negf %102 : vector<8x256xf32>
    %107 = math.exp %106 : vector<8x256xf32>
    %cst_27 = arith.constant 1.000000e+00 : f32
    %108 = vector.broadcast %cst_27 : f32 to vector<8x256xf32>
    %109 = arith.addf %108, %107 : vector<8x256xf32>
    %110 = arith.divf %108, %109 : vector<8x256xf32>
    %111 = vector.extract_strided_slice %110 {offsets = [0, 0], sizes = [8, 64], strides = [1, 1]} : vector<8x256xf32> to vector<8x64xf32>
    %112 = vector.extract_strided_slice %110 {offsets = [0, 64], sizes = [8, 64], strides = [1, 1]} : vector<8x256xf32> to vector<8x64xf32>
    %113 = vector.extract_strided_slice %110 {offsets = [0, 128], sizes = [8, 64], strides = [1, 1]} : vector<8x256xf32> to vector<8x64xf32>
    %cst_28 = arith.constant 2.000000e+00 : f32
    %114 = vector.broadcast %cst_28 : f32 to vector<8x64xf32>
    %115 = arith.mulf %114, %113 : vector<8x64xf32>
    %cst_29 = arith.constant 1.000000e+00 : f32
    %116 = vector.broadcast %cst_29 : f32 to vector<8x64xf32>
    %117 = arith.subf %115, %116 : vector<8x64xf32>
    %118 = vector.extract_strided_slice %110 {offsets = [0, 192], sizes = [8, 64], strides = [1, 1]} : vector<8x256xf32> to vector<8x64xf32>
    %119 = arith.negf %105 : vector<8x256xf32>
    %120 = math.exp %119 : vector<8x256xf32>
    %cst_30 = arith.constant 1.000000e+00 : f32
    %121 = vector.broadcast %cst_30 : f32 to vector<8x256xf32>
    %122 = arith.addf %121, %120 : vector<8x256xf32>
    %123 = arith.divf %121, %122 : vector<8x256xf32>
    %124 = vector.extract_strided_slice %123 {offsets = [0, 0], sizes = [8, 64], strides = [1, 1]} : vector<8x256xf32> to vector<8x64xf32>
    %125 = vector.extract_strided_slice %123 {offsets = [0, 64], sizes = [8, 64], strides = [1, 1]} : vector<8x256xf32> to vector<8x64xf32>
    %126 = vector.extract_strided_slice %123 {offsets = [0, 128], sizes = [8, 64], strides = [1, 1]} : vector<8x256xf32> to vector<8x64xf32>
    %cst_31 = arith.constant 2.000000e+00 : f32
    %127 = vector.broadcast %cst_31 : f32 to vector<8x64xf32>
    %128 = arith.mulf %127, %126 : vector<8x64xf32>
    %cst_32 = arith.constant 1.000000e+00 : f32
    %129 = vector.broadcast %cst_32 : f32 to vector<8x64xf32>
    %130 = arith.subf %128, %129 : vector<8x64xf32>
    %131 = vector.extract_strided_slice %123 {offsets = [0, 192], sizes = [8, 64], strides = [1, 1]} : vector<8x256xf32> to vector<8x64xf32>
    %132 = arith.mulf %112, %90 : vector<8x64xf32>
    %133 = arith.mulf %111, %117 : vector<8x64xf32>
    %134 = arith.addf %132, %133 : vector<8x64xf32>
    %135 = arith.mulf %125, %93 : vector<8x64xf32>
    %136 = arith.mulf %124, %130 : vector<8x64xf32>
    %137 = arith.addf %135, %136 : vector<8x64xf32>
    %138 = math.tanh %134 : vector<8x64xf32>
    %139 = arith.mulf %118, %138 : vector<8x64xf32>
    %140 = math.tanh %137 : vector<8x64xf32>
    %141 = arith.mulf %131, %140 : vector<8x64xf32>
    %142 = vector.extract_strided_slice %7 {offsets = [3, 0, 0], sizes = [1, 16, 256], strides = [1, 1, 1]} : vector<8x16x256xf32> to vector<1x16x256xf32>
    %143 = vector.shape_cast %142 : vector<1x16x256xf32> to vector<16x256xf32>
    %144 = vector.extract_strided_slice %143 {offsets = [0, 0], sizes = [8, 256], strides = [1, 1]} : vector<16x256xf32> to vector<8x256xf32>
    %cst_33 = arith.constant dense<0.000000e+00> : vector<8x256xf32>
    %145 = tpu.matmul %139, %8, %cst_33 {dimension_numbers = #tpu.dot_dimension_numbers<[1], [0], [0], [1], [0, 0, 1, 1], [], []>} : vector<8x64xf32>, vector<64x256xf32>, vector<8x256xf32> -> vector<8x256xf32>
    %146 = arith.addf %144, %145 : vector<8x256xf32>
    %147 = vector.extract_strided_slice %143 {offsets = [8, 0], sizes = [8, 256], strides = [1, 1]} : vector<16x256xf32> to vector<8x256xf32>
    %cst_34 = arith.constant dense<0.000000e+00> : vector<8x256xf32>
    %148 = tpu.matmul %141, %8, %cst_34 {dimension_numbers = #tpu.dot_dimension_numbers<[1], [0], [0], [1], [0, 0, 1, 1], [], []>} : vector<8x64xf32>, vector<64x256xf32>, vector<8x256xf32> -> vector<8x256xf32>
    %149 = arith.addf %147, %148 : vector<8x256xf32>
    %150 = arith.negf %146 : vector<8x256xf32>
    %151 = math.exp %150 : vector<8x256xf32>
    %cst_35 = arith.constant 1.000000e+00 : f32
    %152 = vector.broadcast %cst_35 : f32 to vector<8x256xf32>
    %153 = arith.addf %152, %151 : vector<8x256xf32>
    %154 = arith.divf %152, %153 : vector<8x256xf32>
    %155 = vector.extract_strided_slice %154 {offsets = [0, 0], sizes = [8, 64], strides = [1, 1]} : vector<8x256xf32> to vector<8x64xf32>
    %156 = vector.extract_strided_slice %154 {offsets = [0, 64], sizes = [8, 64], strides = [1, 1]} : vector<8x256xf32> to vector<8x64xf32>
    %157 = vector.extract_strided_slice %154 {offsets = [0, 128], sizes = [8, 64], strides = [1, 1]} : vector<8x256xf32> to vector<8x64xf32>
    %cst_36 = arith.constant 2.000000e+00 : f32
    %158 = vector.broadcast %cst_36 : f32 to vector<8x64xf32>
    %159 = arith.mulf %158, %157 : vector<8x64xf32>
    %cst_37 = arith.constant 1.000000e+00 : f32
    %160 = vector.broadcast %cst_37 : f32 to vector<8x64xf32>
    %161 = arith.subf %159, %160 : vector<8x64xf32>
    %162 = vector.extract_strided_slice %154 {offsets = [0, 192], sizes = [8, 64], strides = [1, 1]} : vector<8x256xf32> to vector<8x64xf32>
    %163 = arith.negf %149 : vector<8x256xf32>
    %164 = math.exp %163 : vector<8x256xf32>
    %cst_38 = arith.constant 1.000000e+00 : f32
    %165 = vector.broadcast %cst_38 : f32 to vector<8x256xf32>
    %166 = arith.addf %165, %164 : vector<8x256xf32>
    %167 = arith.divf %165, %166 : vector<8x256xf32>
    %168 = vector.extract_strided_slice %167 {offsets = [0, 0], sizes = [8, 64], strides = [1, 1]} : vector<8x256xf32> to vector<8x64xf32>
    %169 = vector.extract_strided_slice %167 {offsets = [0, 64], sizes = [8, 64], strides = [1, 1]} : vector<8x256xf32> to vector<8x64xf32>
    %170 = vector.extract_strided_slice %167 {offsets = [0, 128], sizes = [8, 64], strides = [1, 1]} : vector<8x256xf32> to vector<8x64xf32>
    %cst_39 = arith.constant 2.000000e+00 : f32
    %171 = vector.broadcast %cst_39 : f32 to vector<8x64xf32>
    %172 = arith.mulf %171, %170 : vector<8x64xf32>
    %cst_40 = arith.constant 1.000000e+00 : f32
    %173 = vector.broadcast %cst_40 : f32 to vector<8x64xf32>
    %174 = arith.subf %172, %173 : vector<8x64xf32>
    %175 = vector.extract_strided_slice %167 {offsets = [0, 192], sizes = [8, 64], strides = [1, 1]} : vector<8x256xf32> to vector<8x64xf32>
    %176 = arith.mulf %156, %134 : vector<8x64xf32>
    %177 = arith.mulf %155, %161 : vector<8x64xf32>
    %178 = arith.addf %176, %177 : vector<8x64xf32>
    %179 = arith.mulf %169, %137 : vector<8x64xf32>
    %180 = arith.mulf %168, %174 : vector<8x64xf32>
    %181 = arith.addf %179, %180 : vector<8x64xf32>
    %182 = math.tanh %178 : vector<8x64xf32>
    %183 = arith.mulf %162, %182 : vector<8x64xf32>
    %184 = math.tanh %181 : vector<8x64xf32>
    %185 = arith.mulf %175, %184 : vector<8x64xf32>
    %186 = vector.extract_strided_slice %7 {offsets = [4, 0, 0], sizes = [1, 16, 256], strides = [1, 1, 1]} : vector<8x16x256xf32> to vector<1x16x256xf32>
    %187 = vector.shape_cast %186 : vector<1x16x256xf32> to vector<16x256xf32>
    %188 = vector.extract_strided_slice %187 {offsets = [0, 0], sizes = [8, 256], strides = [1, 1]} : vector<16x256xf32> to vector<8x256xf32>
    %cst_41 = arith.constant dense<0.000000e+00> : vector<8x256xf32>
    %189 = tpu.matmul %183, %8, %cst_41 {dimension_numbers = #tpu.dot_dimension_numbers<[1], [0], [0], [1], [0, 0, 1, 1], [], []>} : vector<8x64xf32>, vector<64x256xf32>, vector<8x256xf32> -> vector<8x256xf32>
    %190 = arith.addf %188, %189 : vector<8x256xf32>
    %191 = vector.extract_strided_slice %187 {offsets = [8, 0], sizes = [8, 256], strides = [1, 1]} : vector<16x256xf32> to vector<8x256xf32>
    %cst_42 = arith.constant dense<0.000000e+00> : vector<8x256xf32>
    %192 = tpu.matmul %185, %8, %cst_42 {dimension_numbers = #tpu.dot_dimension_numbers<[1], [0], [0], [1], [0, 0, 1, 1], [], []>} : vector<8x64xf32>, vector<64x256xf32>, vector<8x256xf32> -> vector<8x256xf32>
    %193 = arith.addf %191, %192 : vector<8x256xf32>
    %194 = arith.negf %190 : vector<8x256xf32>
    %195 = math.exp %194 : vector<8x256xf32>
    %cst_43 = arith.constant 1.000000e+00 : f32
    %196 = vector.broadcast %cst_43 : f32 to vector<8x256xf32>
    %197 = arith.addf %196, %195 : vector<8x256xf32>
    %198 = arith.divf %196, %197 : vector<8x256xf32>
    %199 = vector.extract_strided_slice %198 {offsets = [0, 0], sizes = [8, 64], strides = [1, 1]} : vector<8x256xf32> to vector<8x64xf32>
    %200 = vector.extract_strided_slice %198 {offsets = [0, 64], sizes = [8, 64], strides = [1, 1]} : vector<8x256xf32> to vector<8x64xf32>
    %201 = vector.extract_strided_slice %198 {offsets = [0, 128], sizes = [8, 64], strides = [1, 1]} : vector<8x256xf32> to vector<8x64xf32>
    %cst_44 = arith.constant 2.000000e+00 : f32
    %202 = vector.broadcast %cst_44 : f32 to vector<8x64xf32>
    %203 = arith.mulf %202, %201 : vector<8x64xf32>
    %cst_45 = arith.constant 1.000000e+00 : f32
    %204 = vector.broadcast %cst_45 : f32 to vector<8x64xf32>
    %205 = arith.subf %203, %204 : vector<8x64xf32>
    %206 = vector.extract_strided_slice %198 {offsets = [0, 192], sizes = [8, 64], strides = [1, 1]} : vector<8x256xf32> to vector<8x64xf32>
    %207 = arith.negf %193 : vector<8x256xf32>
    %208 = math.exp %207 : vector<8x256xf32>
    %cst_46 = arith.constant 1.000000e+00 : f32
    %209 = vector.broadcast %cst_46 : f32 to vector<8x256xf32>
    %210 = arith.addf %209, %208 : vector<8x256xf32>
    %211 = arith.divf %209, %210 : vector<8x256xf32>
    %212 = vector.extract_strided_slice %211 {offsets = [0, 0], sizes = [8, 64], strides = [1, 1]} : vector<8x256xf32> to vector<8x64xf32>
    %213 = vector.extract_strided_slice %211 {offsets = [0, 64], sizes = [8, 64], strides = [1, 1]} : vector<8x256xf32> to vector<8x64xf32>
    %214 = vector.extract_strided_slice %211 {offsets = [0, 128], sizes = [8, 64], strides = [1, 1]} : vector<8x256xf32> to vector<8x64xf32>
    %cst_47 = arith.constant 2.000000e+00 : f32
    %215 = vector.broadcast %cst_47 : f32 to vector<8x64xf32>
    %216 = arith.mulf %215, %214 : vector<8x64xf32>
    %cst_48 = arith.constant 1.000000e+00 : f32
    %217 = vector.broadcast %cst_48 : f32 to vector<8x64xf32>
    %218 = arith.subf %216, %217 : vector<8x64xf32>
    %219 = vector.extract_strided_slice %211 {offsets = [0, 192], sizes = [8, 64], strides = [1, 1]} : vector<8x256xf32> to vector<8x64xf32>
    %220 = arith.mulf %200, %178 : vector<8x64xf32>
    %221 = arith.mulf %199, %205 : vector<8x64xf32>
    %222 = arith.addf %220, %221 : vector<8x64xf32>
    %223 = arith.mulf %213, %181 : vector<8x64xf32>
    %224 = arith.mulf %212, %218 : vector<8x64xf32>
    %225 = arith.addf %223, %224 : vector<8x64xf32>
    %226 = math.tanh %222 : vector<8x64xf32>
    %227 = arith.mulf %206, %226 : vector<8x64xf32>
    %228 = math.tanh %225 : vector<8x64xf32>
    %229 = arith.mulf %219, %228 : vector<8x64xf32>
    %230 = vector.extract_strided_slice %7 {offsets = [5, 0, 0], sizes = [1, 16, 256], strides = [1, 1, 1]} : vector<8x16x256xf32> to vector<1x16x256xf32>
    %231 = vector.shape_cast %230 : vector<1x16x256xf32> to vector<16x256xf32>
    %232 = vector.extract_strided_slice %231 {offsets = [0, 0], sizes = [8, 256], strides = [1, 1]} : vector<16x256xf32> to vector<8x256xf32>
    %cst_49 = arith.constant dense<0.000000e+00> : vector<8x256xf32>
    %233 = tpu.matmul %227, %8, %cst_49 {dimension_numbers = #tpu.dot_dimension_numbers<[1], [0], [0], [1], [0, 0, 1, 1], [], []>} : vector<8x64xf32>, vector<64x256xf32>, vector<8x256xf32> -> vector<8x256xf32>
    %234 = arith.addf %232, %233 : vector<8x256xf32>
    %235 = vector.extract_strided_slice %231 {offsets = [8, 0], sizes = [8, 256], strides = [1, 1]} : vector<16x256xf32> to vector<8x256xf32>
    %cst_50 = arith.constant dense<0.000000e+00> : vector<8x256xf32>
    %236 = tpu.matmul %229, %8, %cst_50 {dimension_numbers = #tpu.dot_dimension_numbers<[1], [0], [0], [1], [0, 0, 1, 1], [], []>} : vector<8x64xf32>, vector<64x256xf32>, vector<8x256xf32> -> vector<8x256xf32>
    %237 = arith.addf %235, %236 : vector<8x256xf32>
    %238 = arith.negf %234 : vector<8x256xf32>
    %239 = math.exp %238 : vector<8x256xf32>
    %cst_51 = arith.constant 1.000000e+00 : f32
    %240 = vector.broadcast %cst_51 : f32 to vector<8x256xf32>
    %241 = arith.addf %240, %239 : vector<8x256xf32>
    %242 = arith.divf %240, %241 : vector<8x256xf32>
    %243 = vector.extract_strided_slice %242 {offsets = [0, 0], sizes = [8, 64], strides = [1, 1]} : vector<8x256xf32> to vector<8x64xf32>
    %244 = vector.extract_strided_slice %242 {offsets = [0, 64], sizes = [8, 64], strides = [1, 1]} : vector<8x256xf32> to vector<8x64xf32>
    %245 = vector.extract_strided_slice %242 {offsets = [0, 128], sizes = [8, 64], strides = [1, 1]} : vector<8x256xf32> to vector<8x64xf32>
    %cst_52 = arith.constant 2.000000e+00 : f32
    %246 = vector.broadcast %cst_52 : f32 to vector<8x64xf32>
    %247 = arith.mulf %246, %245 : vector<8x64xf32>
    %cst_53 = arith.constant 1.000000e+00 : f32
    %248 = vector.broadcast %cst_53 : f32 to vector<8x64xf32>
    %249 = arith.subf %247, %248 : vector<8x64xf32>
    %250 = vector.extract_strided_slice %242 {offsets = [0, 192], sizes = [8, 64], strides = [1, 1]} : vector<8x256xf32> to vector<8x64xf32>
    %251 = arith.negf %237 : vector<8x256xf32>
    %252 = math.exp %251 : vector<8x256xf32>
    %cst_54 = arith.constant 1.000000e+00 : f32
    %253 = vector.broadcast %cst_54 : f32 to vector<8x256xf32>
    %254 = arith.addf %253, %252 : vector<8x256xf32>
    %255 = arith.divf %253, %254 : vector<8x256xf32>
    %256 = vector.extract_strided_slice %255 {offsets = [0, 0], sizes = [8, 64], strides = [1, 1]} : vector<8x256xf32> to vector<8x64xf32>
    %257 = vector.extract_strided_slice %255 {offsets = [0, 64], sizes = [8, 64], strides = [1, 1]} : vector<8x256xf32> to vector<8x64xf32>
    %258 = vector.extract_strided_slice %255 {offsets = [0, 128], sizes = [8, 64], strides = [1, 1]} : vector<8x256xf32> to vector<8x64xf32>
    %cst_55 = arith.constant 2.000000e+00 : f32
    %259 = vector.broadcast %cst_55 : f32 to vector<8x64xf32>
    %260 = arith.mulf %259, %258 : vector<8x64xf32>
    %cst_56 = arith.constant 1.000000e+00 : f32
    %261 = vector.broadcast %cst_56 : f32 to vector<8x64xf32>
    %262 = arith.subf %260, %261 : vector<8x64xf32>
    %263 = vector.extract_strided_slice %255 {offsets = [0, 192], sizes = [8, 64], strides = [1, 1]} : vector<8x256xf32> to vector<8x64xf32>
    %264 = arith.mulf %244, %222 : vector<8x64xf32>
    %265 = arith.mulf %243, %249 : vector<8x64xf32>
    %266 = arith.addf %264, %265 : vector<8x64xf32>
    %267 = arith.mulf %257, %225 : vector<8x64xf32>
    %268 = arith.mulf %256, %262 : vector<8x64xf32>
    %269 = arith.addf %267, %268 : vector<8x64xf32>
    %270 = math.tanh %266 : vector<8x64xf32>
    %271 = arith.mulf %250, %270 : vector<8x64xf32>
    %272 = math.tanh %269 : vector<8x64xf32>
    %273 = arith.mulf %263, %272 : vector<8x64xf32>
    %274 = vector.extract_strided_slice %7 {offsets = [6, 0, 0], sizes = [1, 16, 256], strides = [1, 1, 1]} : vector<8x16x256xf32> to vector<1x16x256xf32>
    %275 = vector.shape_cast %274 : vector<1x16x256xf32> to vector<16x256xf32>
    %276 = vector.extract_strided_slice %275 {offsets = [0, 0], sizes = [8, 256], strides = [1, 1]} : vector<16x256xf32> to vector<8x256xf32>
    %cst_57 = arith.constant dense<0.000000e+00> : vector<8x256xf32>
    %277 = tpu.matmul %271, %8, %cst_57 {dimension_numbers = #tpu.dot_dimension_numbers<[1], [0], [0], [1], [0, 0, 1, 1], [], []>} : vector<8x64xf32>, vector<64x256xf32>, vector<8x256xf32> -> vector<8x256xf32>
    %278 = arith.addf %276, %277 : vector<8x256xf32>
    %279 = vector.extract_strided_slice %275 {offsets = [8, 0], sizes = [8, 256], strides = [1, 1]} : vector<16x256xf32> to vector<8x256xf32>
    %cst_58 = arith.constant dense<0.000000e+00> : vector<8x256xf32>
    %280 = tpu.matmul %273, %8, %cst_58 {dimension_numbers = #tpu.dot_dimension_numbers<[1], [0], [0], [1], [0, 0, 1, 1], [], []>} : vector<8x64xf32>, vector<64x256xf32>, vector<8x256xf32> -> vector<8x256xf32>
    %281 = arith.addf %279, %280 : vector<8x256xf32>
    %282 = arith.negf %278 : vector<8x256xf32>
    %283 = math.exp %282 : vector<8x256xf32>
    %cst_59 = arith.constant 1.000000e+00 : f32
    %284 = vector.broadcast %cst_59 : f32 to vector<8x256xf32>
    %285 = arith.addf %284, %283 : vector<8x256xf32>
    %286 = arith.divf %284, %285 : vector<8x256xf32>
    %287 = vector.extract_strided_slice %286 {offsets = [0, 0], sizes = [8, 64], strides = [1, 1]} : vector<8x256xf32> to vector<8x64xf32>
    %288 = vector.extract_strided_slice %286 {offsets = [0, 64], sizes = [8, 64], strides = [1, 1]} : vector<8x256xf32> to vector<8x64xf32>
    %289 = vector.extract_strided_slice %286 {offsets = [0, 128], sizes = [8, 64], strides = [1, 1]} : vector<8x256xf32> to vector<8x64xf32>
    %cst_60 = arith.constant 2.000000e+00 : f32
    %290 = vector.broadcast %cst_60 : f32 to vector<8x64xf32>
    %291 = arith.mulf %290, %289 : vector<8x64xf32>
    %cst_61 = arith.constant 1.000000e+00 : f32
    %292 = vector.broadcast %cst_61 : f32 to vector<8x64xf32>
    %293 = arith.subf %291, %292 : vector<8x64xf32>
    %294 = vector.extract_strided_slice %286 {offsets = [0, 192], sizes = [8, 64], strides = [1, 1]} : vector<8x256xf32> to vector<8x64xf32>
    %295 = arith.negf %281 : vector<8x256xf32>
    %296 = math.exp %295 : vector<8x256xf32>
    %cst_62 = arith.constant 1.000000e+00 : f32
    %297 = vector.broadcast %cst_62 : f32 to vector<8x256xf32>
    %298 = arith.addf %297, %296 : vector<8x256xf32>
    %299 = arith.divf %297, %298 : vector<8x256xf32>
    %300 = vector.extract_strided_slice %299 {offsets = [0, 0], sizes = [8, 64], strides = [1, 1]} : vector<8x256xf32> to vector<8x64xf32>
    %301 = vector.extract_strided_slice %299 {offsets = [0, 64], sizes = [8, 64], strides = [1, 1]} : vector<8x256xf32> to vector<8x64xf32>
    %302 = vector.extract_strided_slice %299 {offsets = [0, 128], sizes = [8, 64], strides = [1, 1]} : vector<8x256xf32> to vector<8x64xf32>
    %cst_63 = arith.constant 2.000000e+00 : f32
    %303 = vector.broadcast %cst_63 : f32 to vector<8x64xf32>
    %304 = arith.mulf %303, %302 : vector<8x64xf32>
    %cst_64 = arith.constant 1.000000e+00 : f32
    %305 = vector.broadcast %cst_64 : f32 to vector<8x64xf32>
    %306 = arith.subf %304, %305 : vector<8x64xf32>
    %307 = vector.extract_strided_slice %299 {offsets = [0, 192], sizes = [8, 64], strides = [1, 1]} : vector<8x256xf32> to vector<8x64xf32>
    %308 = arith.mulf %288, %266 : vector<8x64xf32>
    %309 = arith.mulf %287, %293 : vector<8x64xf32>
    %310 = arith.addf %308, %309 : vector<8x64xf32>
    %311 = arith.mulf %301, %269 : vector<8x64xf32>
    %312 = arith.mulf %300, %306 : vector<8x64xf32>
    %313 = arith.addf %311, %312 : vector<8x64xf32>
    %314 = math.tanh %310 : vector<8x64xf32>
    %315 = arith.mulf %294, %314 : vector<8x64xf32>
    %316 = math.tanh %313 : vector<8x64xf32>
    %317 = arith.mulf %307, %316 : vector<8x64xf32>
    %318 = vector.extract_strided_slice %7 {offsets = [7, 0, 0], sizes = [1, 16, 256], strides = [1, 1, 1]} : vector<8x16x256xf32> to vector<1x16x256xf32>
    %319 = vector.shape_cast %318 : vector<1x16x256xf32> to vector<16x256xf32>
    %320 = vector.extract_strided_slice %319 {offsets = [0, 0], sizes = [8, 256], strides = [1, 1]} : vector<16x256xf32> to vector<8x256xf32>
    %cst_65 = arith.constant dense<0.000000e+00> : vector<8x256xf32>
    %321 = tpu.matmul %315, %8, %cst_65 {dimension_numbers = #tpu.dot_dimension_numbers<[1], [0], [0], [1], [0, 0, 1, 1], [], []>} : vector<8x64xf32>, vector<64x256xf32>, vector<8x256xf32> -> vector<8x256xf32>
    %322 = arith.addf %320, %321 : vector<8x256xf32>
    %323 = vector.extract_strided_slice %319 {offsets = [8, 0], sizes = [8, 256], strides = [1, 1]} : vector<16x256xf32> to vector<8x256xf32>
    %cst_66 = arith.constant dense<0.000000e+00> : vector<8x256xf32>
    %324 = tpu.matmul %317, %8, %cst_66 {dimension_numbers = #tpu.dot_dimension_numbers<[1], [0], [0], [1], [0, 0, 1, 1], [], []>} : vector<8x64xf32>, vector<64x256xf32>, vector<8x256xf32> -> vector<8x256xf32>
    %325 = arith.addf %323, %324 : vector<8x256xf32>
    %326 = arith.negf %322 : vector<8x256xf32>
    %327 = math.exp %326 : vector<8x256xf32>
    %cst_67 = arith.constant 1.000000e+00 : f32
    %328 = vector.broadcast %cst_67 : f32 to vector<8x256xf32>
    %329 = arith.addf %328, %327 : vector<8x256xf32>
    %330 = arith.divf %328, %329 : vector<8x256xf32>
    %331 = vector.extract_strided_slice %330 {offsets = [0, 0], sizes = [8, 64], strides = [1, 1]} : vector<8x256xf32> to vector<8x64xf32>
    %332 = vector.extract_strided_slice %330 {offsets = [0, 64], sizes = [8, 64], strides = [1, 1]} : vector<8x256xf32> to vector<8x64xf32>
    %333 = vector.extract_strided_slice %330 {offsets = [0, 128], sizes = [8, 64], strides = [1, 1]} : vector<8x256xf32> to vector<8x64xf32>
    %cst_68 = arith.constant 2.000000e+00 : f32
    %334 = vector.broadcast %cst_68 : f32 to vector<8x64xf32>
    %335 = arith.mulf %334, %333 : vector<8x64xf32>
    %cst_69 = arith.constant 1.000000e+00 : f32
    %336 = vector.broadcast %cst_69 : f32 to vector<8x64xf32>
    %337 = arith.subf %335, %336 : vector<8x64xf32>
    %338 = vector.extract_strided_slice %330 {offsets = [0, 192], sizes = [8, 64], strides = [1, 1]} : vector<8x256xf32> to vector<8x64xf32>
    %339 = arith.negf %325 : vector<8x256xf32>
    %340 = math.exp %339 : vector<8x256xf32>
    %cst_70 = arith.constant 1.000000e+00 : f32
    %341 = vector.broadcast %cst_70 : f32 to vector<8x256xf32>
    %342 = arith.addf %341, %340 : vector<8x256xf32>
    %343 = arith.divf %341, %342 : vector<8x256xf32>
    %344 = vector.extract_strided_slice %343 {offsets = [0, 0], sizes = [8, 64], strides = [1, 1]} : vector<8x256xf32> to vector<8x64xf32>
    %345 = vector.extract_strided_slice %343 {offsets = [0, 64], sizes = [8, 64], strides = [1, 1]} : vector<8x256xf32> to vector<8x64xf32>
    %346 = vector.extract_strided_slice %343 {offsets = [0, 128], sizes = [8, 64], strides = [1, 1]} : vector<8x256xf32> to vector<8x64xf32>
    %cst_71 = arith.constant 2.000000e+00 : f32
    %347 = vector.broadcast %cst_71 : f32 to vector<8x64xf32>
    %348 = arith.mulf %347, %346 : vector<8x64xf32>
    %cst_72 = arith.constant 1.000000e+00 : f32
    %349 = vector.broadcast %cst_72 : f32 to vector<8x64xf32>
    %350 = arith.subf %348, %349 : vector<8x64xf32>
    %351 = vector.extract_strided_slice %343 {offsets = [0, 192], sizes = [8, 64], strides = [1, 1]} : vector<8x256xf32> to vector<8x64xf32>
    %352 = arith.mulf %332, %310 : vector<8x64xf32>
    %353 = arith.mulf %331, %337 : vector<8x64xf32>
    %354 = arith.addf %352, %353 : vector<8x64xf32>
    %355 = arith.mulf %345, %313 : vector<8x64xf32>
    %356 = arith.mulf %344, %350 : vector<8x64xf32>
    %357 = arith.addf %355, %356 : vector<8x64xf32>
    %358 = math.tanh %354 : vector<8x64xf32>
    %359 = arith.mulf %338, %358 : vector<8x64xf32>
    %360 = math.tanh %357 : vector<8x64xf32>
    %361 = arith.mulf %351, %360 : vector<8x64xf32>
    %362 = tpu.concatenate %359, %361 in 0 : vector<8x64xf32>, vector<8x64xf32> -> vector<16x64xf32>
    %363 = vector.extract_strided_slice %0 {offsets = [7, 0, 0], sizes = [1, 16, 32], strides = [1, 1, 1]} : vector<8x16x32xf32> to vector<1x16x32xf32>
    %364 = vector.shape_cast %363 : vector<1x16x32xf32> to vector<16x32xf32>
    %c0_73 = arith.constant 0 : index
    %c0_74 = arith.constant 0 : index
    %365 = vector.load %arg5[%c0_73, %c0_74] : memref<32x256xf32, #tpu.memory_space<vmem>>, vector<32x256xf32>
    %cst_75 = arith.constant dense<0.000000e+00> : vector<16x256xf32>
    %366 = tpu.matmul %364, %365, %cst_75 {dimension_numbers = #tpu.dot_dimension_numbers<[1], [0], [0], [1], [0, 0, 1, 1], [], []>} : vector<16x32xf32>, vector<32x256xf32>, vector<16x256xf32> -> vector<16x256xf32>
    %c0_76 = arith.constant 0 : index
    %c0_77 = arith.constant 0 : index
    %367 = vector.load %arg6[%c0_76, %c0_77] : memref<1x256xf32, #tpu.memory_space<vmem>>, vector<1x256xf32>
    %368 = vector.broadcast %367 : vector<1x256xf32> to vector<16x256xf32>
    %369 = arith.addf %366, %368 : vector<16x256xf32>
    %370 = arith.negf %369 : vector<16x256xf32>
    %371 = math.exp %370 : vector<16x256xf32>
    %cst_78 = arith.constant 1.000000e+00 : f32
    %372 = vector.broadcast %cst_78 : f32 to vector<16x256xf32>
    %373 = arith.addf %372, %371 : vector<16x256xf32>
    %374 = arith.divf %372, %373 : vector<16x256xf32>
    %375 = vector.extract_strided_slice %374 {offsets = [0, 0], sizes = [16, 64], strides = [1, 1]} : vector<16x256xf32> to vector<16x64xf32>
    %376 = vector.extract_strided_slice %374 {offsets = [0, 128], sizes = [16, 64], strides = [1, 1]} : vector<16x256xf32> to vector<16x64xf32>
    %cst_79 = arith.constant 2.000000e+00 : f32
    %377 = vector.broadcast %cst_79 : f32 to vector<16x64xf32>
    %378 = arith.mulf %377, %376 : vector<16x64xf32>
    %cst_80 = arith.constant 1.000000e+00 : f32
    %379 = vector.broadcast %cst_80 : f32 to vector<16x64xf32>
    %380 = arith.subf %378, %379 : vector<16x64xf32>
    %381 = vector.extract_strided_slice %374 {offsets = [0, 192], sizes = [16, 64], strides = [1, 1]} : vector<16x256xf32> to vector<16x64xf32>
    %382 = arith.mulf %375, %380 : vector<16x64xf32>
    %383 = math.tanh %382 : vector<16x64xf32>
    %384 = arith.mulf %381, %383 : vector<16x64xf32>
    %385 = tpu.concatenate %362, %384 in 1 : vector<16x64xf32>, vector<16x64xf32> -> vector<16x128xf32>
    %c0_81 = arith.constant 0 : index
    %c0_82 = arith.constant 0 : index
    %386 = vector.load %arg7[%c0_81, %c0_82] : memref<128x128xf32, #tpu.memory_space<vmem>>, vector<128x128xf32>
    %cst_83 = arith.constant dense<0.000000e+00> : vector<16x128xf32>
    %387 = tpu.matmul %385, %386, %cst_83 {dimension_numbers = #tpu.dot_dimension_numbers<[1], [0], [0], [1], [0, 0, 1, 1], [], []>} : vector<16x128xf32>, vector<128x128xf32>, vector<16x128xf32> -> vector<16x128xf32>
    %c0_84 = arith.constant 0 : index
    %c0_85 = arith.constant 0 : index
    %388 = vector.load %arg8[%c0_84, %c0_85] : memref<1x128xf32, #tpu.memory_space<vmem>>, vector<1x128xf32>
    %389 = vector.broadcast %388 : vector<1x128xf32> to vector<16x128xf32>
    %390 = arith.addf %387, %389 : vector<16x128xf32>
    %c0_86 = arith.constant 0 : index
    %c0_87 = arith.constant 0 : index
    %391 = vector.load %arg9[%c0_86, %c0_87] : memref<16x128xf32, #tpu.memory_space<vmem>>, vector<16x128xf32>
    tpu.vector_store %arg9[%c0_86, %c0_87], %390 {strides = array<i32>} : memref<16x128xf32, #tpu.memory_space<vmem>>, vector<16x128xf32>,
    return
  }
  func.func @transform_0(%arg0: i32) -> (i32, i32, i32) {
    %c0_i32 = arith.constant 0 : i32
    %c0_i32_0 = arith.constant 0 : i32
    %c0_i32_1 = arith.constant 0 : i32
    return %c0_i32, %arg0, %c0_i32_0 : i32, i32, i32
  }
  func.func @transform_1(%arg0: i32) -> (i32, i32) {
    %c0_i32 = arith.constant 0 : i32
    %c0_i32_0 = arith.constant 0 : i32
    %c0_i32_1 = arith.constant 0 : i32
    return %c0_i32, %c0_i32_0 : i32, i32
  }
  func.func @transform_2(%arg0: i32) -> (i32, i32) {
    %c0_i32 = arith.constant 0 : i32
    %c0_i32_0 = arith.constant 0 : i32
    %c0_i32_1 = arith.constant 0 : i32
    return %c0_i32, %c0_i32_0 : i32, i32
  }
  func.func @transform_3(%arg0: i32) -> (i32, i32) {
    %c0_i32 = arith.constant 0 : i32
    %c0_i32_0 = arith.constant 0 : i32
    %c0_i32_1 = arith.constant 0 : i32
    return %c0_i32, %c0_i32_0 : i32, i32
  }
  func.func @transform_4(%arg0: i32) -> (i32, i32) {
    %c0_i32 = arith.constant 0 : i32
    %c0_i32_0 = arith.constant 0 : i32
    %c0_i32_1 = arith.constant 0 : i32
    return %c0_i32, %c0_i32_0 : i32, i32
  }
  func.func @transform_5(%arg0: i32) -> (i32, i32) {
    %c0_i32 = arith.constant 0 : i32
    %c0_i32_0 = arith.constant 0 : i32
    %c0_i32_1 = arith.constant 0 : i32
    return %c0_i32, %c0_i32_0 : i32, i32
  }
  func.func @transform_6(%arg0: i32) -> (i32, i32) {
    %c0_i32 = arith.constant 0 : i32
    %c0_i32_0 = arith.constant 0 : i32
    %c0_i32_1 = arith.constant 0 : i32
    return %c0_i32, %c0_i32_0 : i32, i32
  }
  func.func @transform_7(%arg0: i32) -> (i32, i32) {
    %c0_i32 = arith.constant 0 : i32
    %c0_i32_0 = arith.constant 0 : i32
    %c0_i32_1 = arith.constant 0 : i32
    return %c0_i32, %c0_i32_0 : i32, i32
  }
  func.func @transform_8(%arg0: i32) -> (i32, i32) {
    %c0_i32 = arith.constant 0 : i32
    %c0_i32_0 = arith.constant 0 : i32
    return %arg0, %c0_i32 : i32, i32
  }
}

</mosaic_0001>

<bundles_post_ra>
// kernel: tpu_custom_call.1
= control target key start
LH: loop header
LB: loop body
LE: loop exit
PB: predicated region body
PF: predicated region fallthrough
CT: control target
= control target key end

     0   :  { %13 = vsyncpa [#allocation3], 0  ;;  %s3349_s0 = inlined_call_operand.hbm [shape: f32[8,16,32], index: 0, kind: input, shape index: {}]   ;;  %s3350_s1 = inlined_call_operand.hbm [shape: f32[32,256], index: 1, kind: input, shape index: {}]   ;;  %s3351_s2 = inlined_call_operand.vmem [shape: f32[1,256], index: 2, kind: input, shape index: {}]   ;;  %s3352_s3 = inlined_call_operand.hbm [shape: f32[64,256], index: 3, kind: input, shape index: {}]   ;;  %s3353_s4 = inlined_call_operand.hbm [shape: f32[32,256], index: 4, kind: input, shape index: {}]   ;;  %s3354_s5 = inlined_call_operand.vmem [shape: f32[1,256], index: 5, kind: input, shape index: {}]   ;;  %s3355_s6 = inlined_call_operand.hbm [shape: f32[128,128], index: 6, kind: input, shape index: {}]   ;;  %s3356_s7 = inlined_call_operand.vmem [shape: f32[1,128], index: 7, kind: input, shape index: {}]   ;;  %s3357_s8 = inlined_call_operand.hbm [shape: f32[16,128], index: 8, kind: output, shape index: {}]  }
   0x1   :  { %14 = vsyncpa [#allocation6], 0 }
   0x2   :  { %15 = vsyncpa [#allocation9], 0 }
   0x3   :  { %16 = vsyncpa [#allocation4], 0  ;;  %s2658_s27 = smov [#allocation5]  }
   0x4   :  { %s34_s28 = sshll.u32 %s2658_s27, 4  ;;  %s35_s28 = int_to_ptr.vmem [resolvable:$true] %s34_s28 }
   0x5   :  { %s2538_s29 = scalar_lea.vmem %s35_s28, 1024  ;;  %p2543_p1 = scmp.lt.s32.totalorder %s35_s28, %s35_s28 }
   0x6   :  { %p2539_p0 = scmp.ne.s32.totalorder %s35_s28, %s2538_s29  ;;  %p2544_p2 = scmp.lt.s32.totalorder %s2538_s29, %s2538_s29 }
   0x8   :  { %p2545_p3 = por %p2544_p2, %p2543_p1 }
   0xa   :  { %p2546_p4 = pnand %p2545_p3, %p2539_p0 }
   0xc   :  { %2549 = shalt.err (!%p2546_p4)
}
   0xd   :  { %s2659_s30 = smov 256   ;;  %s2660_s9 = smov 16  }
   0xe   :  { %40 = dma.hbm_to_vmem [thread:$0]  %s3350_s1, 1024, %s35_s28, [#allocation6], %s2659_s30, %s2659_s30, %s2660_s9  }
   0xf   :  { %s2661_s12 = smov [#allocation8]   ;;  %s2662_s14 = smov [#allocation2]  }
  0x10   :  { %s60_s13 = sshll.u32 %s2661_s12, 4  ;;  %s22_s15 = sshll.u32 %s2662_s14, 4  ;;  %s61_s13 = int_to_ptr.vmem [resolvable:$true] %s60_s13  ;;  %s23_s15 = int_to_ptr.vmem [resolvable:$true] %s22_s15 }
  0x11   :  { %s2558_s16 = scalar_lea.vmem %s61_s13, 1024  ;;  %p2563_p6 = scmp.lt.s32.totalorder %s61_s13, %s61_s13 }
  0x12   :  { %p2559_p5 = scmp.ne.s32.totalorder %s61_s13, %s2558_s16  ;;  %p2564_p7 = scmp.lt.s32.totalorder %s2558_s16, %s2558_s16 }
  0x14   :  { %p2565_p8 = por %p2564_p7, %p2563_p6 }
  0x16   :  { %p2566_p9 = pnand %p2565_p8, %p2559_p5 }
  0x18   :  { %2569 = shalt.err (!%p2566_p9)
}
  0x19   :  { %66 = dma.hbm_to_vmem [thread:$0]  %s3353_s4, 1024, %s61_s13, [#allocation9], %s2659_s30, %s2659_s30, %s2660_s9  }
  0x1a   :  { %s2578_s1 = scalar_lea.vmem %s23_s15, 2048  ;;  %p2583_p11 = scmp.lt.s32.totalorder %s23_s15, %s23_s15 }
  0x1b   :  { %p2579_p10 = scmp.ne.s32.totalorder %s23_s15, %s2578_s1  ;;  %p2584_p12 = scmp.lt.s32.totalorder %s2578_s1, %s2578_s1 }
  0x1d   :  { %p2585_p13 = por %p2584_p12, %p2583_p11 }
  0x1f   :  { %p2586_p0 = pnand %p2585_p13, %p2579_p10 }
  0x21   :  { %2589 = shalt.err (!%p2586_p0)
}
  0x22   :  { %s2663_s19 = smov 128   ;;  %s2664_s20 = smov 8  }
  0x23   :  { %28 = dma.hbm_to_vmem [thread:$0]  %s3349_s0, 2048, %s23_s15, [#allocation3], %s2663_s19, %s2663_s19, %s2664_s20  }
  0x24   :  { %s2665_s23 = smov [#allocation7]   ;;  %s2666_s4 = smov [#allocation10]  }
  0x25   :  { %s48_s24 = sshll.u32 %s2665_s23, 4  ;;  %s74_s25 = sshll.u32 %s2666_s4, 4  ;;  %s49_s24 = int_to_ptr.vmem [resolvable:$true] %s48_s24  ;;  %s75_s25 = int_to_ptr.vmem [resolvable:$true] %s74_s25 }
  0x26   :  { %s2598_s26 = scalar_lea.vmem %s49_s24, 2048  ;;  %p2603_p2 = scmp.lt.s32.totalorder %s49_s24, %s49_s24 }
  0x27   :  { %p2599_p1 = scmp.ne.s32.totalorder %s49_s24, %s2598_s26  ;;  %p2604_p3 = scmp.lt.s32.totalorder %s2598_s26, %s2598_s26 }
  0x29   :  { %p2605_p4 = por %p2604_p3, %p2603_p2 }
  0x2b   :  { %p2606_p5 = pnand %p2605_p4, %p2599_p1 }
  0x2d   :  { %2609 = shalt.err (!%p2606_p5)
}
  0x2e   :  { %54 = dma.hbm_to_vmem [thread:$0]  %s3352_s3, 2048, %s49_s24, [#allocation6], %s2659_s30, %s2659_s30, %s2660_s9  }
  0x2f   :  { %s2618_s0 = scalar_lea.vmem %s75_s25, 2048  ;;  %p2623_p7 = scmp.lt.s32.totalorder %s75_s25, %s75_s25 }
  0x30   :  { %p2619_p6 = scmp.ne.s32.totalorder %s75_s25, %s2618_s0  ;;  %p2624_p8 = scmp.lt.s32.totalorder %s2618_s0, %s2618_s0 }
  0x32   :  { %p2625_p9 = por %p2624_p8, %p2623_p7 }
  0x34   :  { %p2626_p10 = pnand %p2625_p9, %p2619_p6 }
  0x36   :  { %2629 = shalt.err (!%p2626_p10)
}
  0x37   :  { %80 = dma.hbm_to_vmem [thread:$0]  %s3355_s6, 2048, %s75_s25, [#allocation9], %s2663_s19, %s2663_s19, %s2664_s20  }
  0x38   :  { %2650 = dma.done.wait [#allocation3], 2048  }
  0x39   :  { %2651 = vsyncadd [#allocation3], 4294965248 }
  0x3a   :  { %2652 = dma.done.wait [#allocation6], 3072  }
  0x3b   :  { %2653 = vsyncadd [#allocation6], 4294964224 }
  0x3c   :  { %2654 = dma.done.wait [#allocation9], 3072  }
  0x3d   :  { %2655 = vsyncadd [#allocation9], 4294964224  ;;  %v2667_v0 = vmov 0.0   ;;  %v121_v1 = vld [vmem:[#allocation5 + $0x38] sm:$0xff]  ;;  %v120_v2 = vld [vmem:[#allocation5 + $0x30] sm:$0xff]  ;;  %vm134_vm0 = vcmask 261120   ;;  %v124_v31 = vlaneseq }
  0x3e   :  { %319 = vmatprep.mubr.f32.mxu1 %v2667_v0  ;;  %247 = vmatprep.mubr.f32.mxu0 %v2667_v0  ;;  %v119_v3 = vld [vmem:[#allocation5 + $0x28] sm:$0xff]  ;;  %v118_v4 = vld [vmem:[#allocation5 + $0x20] sm:$0xff]  ;;  %v117_v5 = vld [vmem:[#allocation5 + $0x18] sm:$0xff]  ;;  %vm360_vm1 = vcmask 523264   ;;  %s2669_s12 = smov [#allocation11]  }
  0x3f   :  { %2307 = vmatprep.subr.mxu1 %v121_v1  ;;  %207 = vmatprep.subr.mxu0 %v121_v1  ;;  %v116_v6 = vld [vmem:[#allocation5 + $0x10] sm:$0xff]  ;;  %v115_v7 = vld [vmem:[#allocation5 + $0x8] sm:$0xff]  ;;  %v114_v8 = vld [vmem:[#allocation5] sm:$0xff]  ;;  %v2847_v35 = vshrl.u32 %v124_v31, 7  ;;  %s2153_s13 = sshll.u32 %s2669_s12, 4  ;;  %s2154_s13 = int_to_ptr.vmem [resolvable:$true] %s2153_s13 }
  0x40   :  { %2311 = vmatpush1.msra.mxu1 %v120_v2  ;;  %208 = vmatpush1.msra.mxu0 %v120_v2  ;;  %v110_v9 = vld [vmem:[#allocation2 + $0x60] sm:$0xff]  ;;  %v2747_v10 = vld [vmem:[#allocation7 + $0x78] sm:$0xff]  ;;  %v2749_v11 = vld [vmem:[#allocation7 + $0x70] sm:$0xff]  ;;  %s2630_s14 = scalar_lea.vmem %s2154_s13, 256  ;;  %p2635_p12 = scmp.lt.s32.totalorder %s2154_s13, %s2154_s13 }
  0x41   :  { %2308 = vmatprep.subr.mxu1 %v119_v3  ;;  %209 = vmatprep.subr.mxu0 %v119_v3  ;;  %v2751_v12 = vld [vmem:[#allocation7 + $0x68] sm:$0xff]  ;;  %v98_v13 = vld [vmem:[#allocation2] sm:$0xff]  ;;  %v2759_v16 = vld [vmem:[#allocation7 + $0x58] sm:$0xff]  ;;  %v126_v39 = vsub.s32 0, %v2847_v35  ;;  %v130_v43 = vsub.s32 1, %v2847_v35  ;;  %p2631_p11 = scmp.ne.s32.totalorder %s2154_s13, %s2630_s14  ;;  %p2636_p13 = scmp.lt.s32.totalorder %s2630_s14, %s2630_s14 }
  0x42   :  { %2312 = vmatpush1.msra.mxu1 %v118_v4  ;;  %210 = vmatpush1.msra.mxu0 %v118_v4  ;;  %v2755_v14 = vld [vmem:[#allocation7 + $0x60] sm:$0xff]  ;;  %v111_v15 = vld [vmem:[#allocation2 + $0x68] sm:$0xff]  ;;  %v2762_v17 = vld [vmem:[#allocation7 + $0x50] sm:$0xff] }
  0x43   :  { %2309 = vmatprep.subr.mxu1 %v117_v5  ;;  %211 = vmatprep.subr.mxu0 %v117_v5  ;;  %v2766_v18 = vld [vmem:[#allocation7 + $0x48] sm:$0xff]  ;;  %v2771_v20 = vld [vmem:[#allocation7 + $0x40] sm:$0xff]  ;;  %v112_v21 = vld [vmem:[#allocation2 + $0x70] sm:$0xff]  ;;  %p2637_p0 = por %p2636_p13, %p2635_p12 }
  0x44   :  { %2313 = vmatpush1.msra.mxu1 %v116_v6  ;;  %212 = vmatpush1.msra.mxu0 %v116_v6  ;;  %v99_v19 = vld [vmem:[#allocation2 + $0x8] sm:$0xff]  ;;  %v2775_v22 = vld [vmem:[#allocation7 + $0x38] sm:$0xff]  ;;  %v2778_v23 = vld [vmem:[#allocation7 + $0x30] sm:$0xff] }
  0x45   :  { %2310 = vmatprep.subr.mxu1 %v115_v7  ;;  %213 = vmatprep.subr.mxu0 %v115_v7  ;;  %v2782_v24 = vld [vmem:[#allocation7 + $0x28] sm:$0xff]  ;;  %v2787_v25 = vld [vmem:[#allocation7 + $0x20] sm:$0xff]  ;;  %v113_v26 = vld [vmem:[#allocation2 + $0x78] sm:$0xff]  ;;  %p2638_p1 = pnand %p2637_p0, %p2631_p11 }
  0x46   :  { %2314 = vmatpush1.msra.mxu1 %v114_v8  ;;  %214 = vmatpush1.msra.mxu0 %v114_v8  ;;  %v2791_v27 = vld [vmem:[#allocation7 + $0x18] sm:$0xff]  ;;  %v2794_v28 = vld [vmem:[#allocation7 + $0x10] sm:$0xff]  ;;  %v2798_v29 = vld [vmem:[#allocation7 + $0x8] sm:$0xff] }
  0x47   :  { %2179 = vmatmul.mubr.msk.f32.vlgmr.msra.gmra.mxu1 %vm134_vm0, %v110_v9  ;;  %380 = vmatprep.subr.mxu1 %v2747_v10  ;;  %v2803_v30 = vld [vmem:[#allocation7] sm:$0xff] }
  0x48   :  { %381 = vmatpush1.msra.mxu1 %v2749_v11  ;;  %325 = vmatprep.mubr.f32.mxu1 %v2667_v0  ;;  %v122_v40 = vld [vmem:[%s3351_s2] sm:$0x3]  ;;  %s2668_s2 = smov 64  }
  0x49   :  { %382 = vmatprep.subr.mxu1 %v2751_v12  ;;  %2167 = vmatmul.mubr.msk.f32.vlgmr.msra.gmra.mxu0 %vm134_vm0, %v98_v13  ;;  %v2864_v45 = vrot.slane %v122_v40, %v126_v39  ;;  %v2870_v48 = vrot.slane %v122_v40, %v130_v43 }
  0x4a   :  { %383 = vmatpush1.msra.mxu1 %v2755_v14  ;;  %253 = vmatprep.mubr.f32.mxu0 %v2667_v0 }
  0x4b   :  { %2180 = vmatmul.mubr.msk.f32.gmra.mxu1 %vm134_vm0, %v111_v15  ;;  %384 = vmatprep.subr.mxu1 %v2759_v16 }
  0x4c   :  { %385 = vmatpush1.msra.mxu1 %v2762_v17  ;;  %331 = vmatprep.mubr.f32.mxu1 %v2667_v0 }
  0x4d   :  { %386 = vmatprep.subr.mxu1 %v2766_v18  ;;  %2168 = vmatmul.mubr.msk.f32.gmra.mxu0 %vm134_vm0, %v99_v19 }
  0x4e   :  { %387 = vmatpush1.msra.mxu1 %v2771_v20  ;;  %259 = vmatprep.mubr.f32.mxu0 %v2667_v0 }
  0x4f   :  { %2181 = vmatmul.mubr.msk.f32.gmra.mxu1 %vm134_vm0, %v112_v21  ;;  %388 = vmatprep.subr.mxu1 %v2775_v22 }
  0x50   :  { %389 = vmatpush1.msra.mxu1 %v2778_v23  ;;  %337 = vmatprep.mubr.f32.mxu1 %v2667_v0 }
  0x51   :  { %390 = vmatprep.subr.mxu1 %v2782_v24  ;;  %786 = vmatprep.subr.mxu0 %v2747_v10 }
  0x52   :  { %391 = vmatpush1.msra.mxu1 %v2787_v25  ;;  %787 = vmatpush1.msra.mxu0 %v2749_v11 }
  0x53   :  { %2182 = vmatmul.mubr.msk.f32.gmra.mxu1 %vm134_vm0, %v113_v26  ;;  %392 = vmatprep.subr.mxu1 %v2791_v27 }
  0x54   :  { %393 = vmatpush1.msra.mxu1 %v2794_v28  ;;  %428 = vmatprep.mubr.f32.mxu1 %v2667_v0 }
  0x55   :  { %394 = vmatprep.subr.mxu1 %v2798_v29  ;;  %788 = vmatprep.subr.mxu0 %v2751_v12 }
  0x56   :  { %395 = vmatpush1.msra.mxu1 %v2803_v30  ;;  %789 = vmatpush1.msra.mxu0 %v2755_v14 }
  0x57   :  { %429 = vmatmul.mubr.f32.vlgmr.msra.gmra.mxu1 %v2667_v0  ;;  %506 = vmatprep.subr.mxu1 %v2747_v10 }
  0x58   :  { %507 = vmatpush1.msra.mxu1 %v2749_v11  ;;  %554 = vmatprep.mubr.f32.mxu1 %v2667_v0 }
  0x59   :  { %508 = vmatprep.subr.mxu1 %v2751_v12  ;;  %790 = vmatprep.subr.mxu0 %v2759_v16 }
  0x5a   :  { %509 = vmatpush1.msra.mxu1 %v2755_v14  ;;  %791 = vmatpush1.msra.mxu0 %v2762_v17 }
  0x5b   :  { %510 = vmatprep.subr.mxu1 %v2759_v16  ;;  %792 = vmatprep.subr.mxu0 %v2766_v18 }
  0x5c   :  { %511 = vmatpush1.msra.mxu1 %v2762_v17  ;;  %793 = vmatpush1.msra.mxu0 %v2771_v20 }
  0x5d   :  { %512 = vmatprep.subr.mxu1 %v2766_v18  ;;  %794 = vmatprep.subr.mxu0 %v2775_v22 }
  0x5e   :  { %513 = vmatpush1.msra.mxu1 %v2771_v20  ;;  %795 = vmatpush1.msra.mxu0 %v2778_v23 }
  0x5f   :  { %514 = vmatprep.subr.mxu1 %v2775_v22  ;;  %796 = vmatprep.subr.mxu0 %v2782_v24 }
  0x60   :  { %515 = vmatpush1.msra.mxu1 %v2778_v23  ;;  %797 = vmatpush1.msra.mxu0 %v2787_v25 }
  0x61   :  { %516 = vmatprep.subr.mxu1 %v2782_v24  ;;  %798 = vmatprep.subr.mxu0 %v2791_v27 }
  0x62   :  { %517 = vmatpush1.msra.mxu1 %v2787_v25  ;;  %799 = vmatpush1.msra.mxu0 %v2794_v28 }
  0x63   :  { %518 = vmatprep.subr.mxu1 %v2791_v27  ;;  %800 = vmatprep.subr.mxu0 %v2798_v29 }
  0x64   :  { %519 = vmatpush1.msra.mxu1 %v2794_v28  ;;  %801 = vmatpush1.msra.mxu0 %v2803_v30 }
  0x65   :  { %520 = vmatprep.subr.mxu1 %v2798_v29  ;;  %988 = vmatprep.subr.mxu0 %v2747_v10 }
  0x66   :  { %521 = vmatpush1.msra.mxu1 %v2803_v30 }
  0x67   :  { %584 = vmatprep.subr.mxu1 %v2747_v10 }
 0x107   :  { %v2843_v32 = vpop.f32.mrf.mxu1 }
 0x109   :  { %v2845_v33 = vpop.f32.mrf.mxu1  ;;  %v249_v34 = vpop.f32.mrf.mxu0 }
 0x10a   :  { %v250_v49 = vadd.f32 %v249_v34, %v2864_v45 }
 0x10b   :  { %v2849_v36 = vpop.f32.mrf.mxu1  ;;  %v251_v37 = vpop.f32.mrf.mxu0 }
 0x10c   :  { %v252_v54 = vadd.f32 %v251_v37, %v2870_v48 }
 0x10d   :  { %v2851_v38 = vpop.f32.mrf.mxu1  ;;  %v255_v42 = vpop.f32.mrf.mxu0 }
 0x10e   :  { %v256_v51 = vadd.f32 %v255_v42, %v2864_v45  ;;  %v100_v42 = vld [vmem:[#allocation2 + $0x10] sm:$0xff] }
 0x10f   :  { %v2857_v41 = vpop.f32.mrf.mxu1  ;;  %v257_v47 = vpop.f32.mrf.mxu0  ;;  %2169 = vmatmul.mubr.msk.f32.gmra.mxu0 %vm134_vm0, %v100_v42 }
 0x110   :  { %v258_v52 = vadd.f32 %v257_v47, %v2870_v48  ;;  %265 = vmatprep.mubr.f32.mxu0 %v2667_v0 }
 0x111   :  { %v2860_v44 = vpop.f32.mrf.mxu1 }
 0x113   :  { %v2866_v46 = vpop.f32.mrf.mxu1 }
 0x115   :  { %v2873_v50 = vpop.f32.mrf.mxu1 }
 0x117   :  { %v430_v53 = vpop.f32.mrf.mxu1 }
 0x118   :  { %v435_v55 = vadd.f32 %v430_v53, %v250_v49  ;;  %v437_v57 = vadd.f32 %v430_v53, %v256_v51 }
 0x119   :  { %v432_v56 = vpop.f32.mrf.mxu1 }
 0x11a   :  { %v2183_v58 = vmul.f32 -1.442695, %v435_v55  ;;  %v436_v59 = vadd.f32 %v432_v56, %v252_v54  ;;  %v438_v60 = vadd.f32 %v432_v56, %v258_v52  ;;  %v2186_v63 = vmul.f32 -1.442695, %v437_v57  ;;  %v101_v57 = vld [vmem:[#allocation2 + $0x18] sm:$0xff] }
 0x11b   :  { %2170 = vmatmul.mubr.msk.f32.gmra.mxu0 %vm134_vm0, %v101_v57 }
 0x11c   :  { %v2184_v61 = vmul.f32 -1.442695, %v436_v59  ;;  %v2187_v62 = vmul.f32 -1.442695, %v438_v60  ;;  %2332 = vpow2.f32 %v2183_v58  ;;  %271 = vmatprep.mubr.f32.mxu0 %v2667_v0 }
 0x11e   :  { %2334 = vpow2.f32 %v2184_v61 }
 0x11f   :  { %2336 = vpow2.f32 %v2187_v62 }
 0x120   :  { %2338 = vpow2.f32 %v2186_v63 }
 0x129   :  { %v2333_v1 = vpop.eup %2332 }
 0x12a   :  { %v445_v6 = vadd.f32 1.0, %v2333_v1 }
 0x12b   :  { %v2335_v2 = vpop.eup %2334 }
 0x12c   :  { %v2337_v3 = vpop.eup %2336  ;;  %v446_v4 = vadd.f32 1.0, %v2335_v2 }
 0x12d   :  { %v460_v5 = vadd.f32 1.0, %v2337_v3  ;;  %v2339_v7 = vpop.eup %2338 }
 0x12e   :  { %2340 = vrcp.f32 %v446_v4  ;;  %v459_v8 = vadd.f32 1.0, %v2339_v7 }
 0x12f   :  { %2342 = vrcp.f32 %v460_v5 }
 0x130   :  { %2344 = vrcp.f32 %v445_v6 }
 0x131   :  { %2346 = vrcp.f32 %v459_v8 }
 0x13b   :  { %v2341_v9 = vpop.eup %2340 }
 0x13c   :  { %v2343_v13 = vpop.eup %2342  ;;  %v451_v15 = vmul.f32 2.0, %v2341_v9 }
 0x13d   :  { %v465_v19 = vmul.f32 2.0, %v2343_v13  ;;  %v2345_v26 = vpop.eup %2344 }
 0x13e   :  { %v2185_v21 = vadd.f32 -1.0, %v451_v15  ;;  %v2347_v37 = vpop.eup %2346  ;;  %v467_v47 = vmul.f32 0.0, %v2345_v26 }
 0x13f   :  { %v2188_v34 = vadd.f32 -1.0, %v465_v19  ;;  %v474_v52 = vmul.f32 0.0, %v2347_v37 }
 0x140   :  { %v468_v31 = vmul.f32 %v2345_v26, %v2185_v21 }
 0x141   :  { %v475_v40 = vmul.f32 %v2347_v37, %v2188_v34 }
 0x142   :  { %470 = vrot.lane.b32.xlu0 %v468_v31, %s2668_s2 }
 0x146   :  { %477 = vrot.lane.b32.xlu0 %v475_v40, %s2668_s2 }
 0x1b4   :  { %v471_v49 = vpop.permute.xlu0 %470 }
 0x1b5   :  { %v2882_v51 = vadd.f32 %v471_v49, %v467_v47 }
 0x1b7   :  { %2348 = vtanh.f32 %v2882_v51 }
 0x1b8   :  { %v478_v53 = vpop.permute.xlu0 %477 }
 0x1b9   :  { %v2885_v54 = vadd.f32 %v478_v53, %v474_v52 }
 0x1bb   :  { %2350 = vtanh.f32 %v2885_v54 }
 0x1c4   :  { %v2349_v55 = vpop.eup %2348 }
 0x1c5   :  { %v482_v56 = vmul.f32 %v2349_v55, %v2341_v9 }
 0x1c7   :  { %486 = vrot.lane.b32.xlu1 %v482_v56, %s2668_s2 }
 0x1c8   :  { %v2351_v58 = vpop.eup %2350 }
 0x1c9   :  { %v484_v59 = vmul.f32 %v2351_v58, %v2343_v13 }
 0x1cb   :  { %564 = vrot.lane.b32.xlu1 %v484_v59, %s2668_s2 }
 0x1cf   :  { %v261_v62 = vpop.f32.mrf.mxu0 }
 0x1d0   :  { %v262_v1 = vadd.f32 %v261_v62, %v2864_v45 }
 0x1d1   :  { %v263_v63 = vpop.f32.mrf.mxu0 }
 0x1d2   :  { %v264_v2 = vadd.f32 %v263_v63, %v2870_v48 }
 0x1db   :  { %v267_v9 = vpop.f32.mrf.mxu0 }
 0x1dc   :  { %v268_v13 = vadd.f32 %v267_v9, %v2864_v45  ;;  %v106_v9 = vld [vmem:[#allocation2 + $0x40] sm:$0xff] }
 0x1dd   :  { %v269_v15 = vpop.f32.mrf.mxu0 }
 0x1de   :  { %v270_v21 = vadd.f32 %v269_v15, %v2870_v48 }
 0x239   :  { %v487_v60 = vpop.permute.xlu1 %486 }
 0x23a   :  { %2189 = vmatmul.mubr.msk.f32.vlgmr.msra.gmra.mxu1 %vm360_vm1, %v487_v60 }
 0x23b   :  { %585 = vmatpush1.msra.mxu1 %v2749_v11  ;;  %632 = vmatprep.mubr.f32.mxu1 %v2667_v0 }
 0x23c   :  { %586 = vmatprep.subr.mxu1 %v2751_v12 }
 0x23d   :  { %587 = vmatpush1.msra.mxu1 %v2755_v14  ;;  %v565_v61 = vpop.permute.xlu1 %564 }
 0x23e   :  { %588 = vmatprep.subr.mxu1 %v2759_v16 }
 0x23f   :  { %589 = vmatpush1.msra.mxu1 %v2762_v17 }
 0x240   :  { %590 = vmatprep.subr.mxu1 %v2766_v18 }
 0x241   :  { %591 = vmatpush1.msra.mxu1 %v2771_v20 }
 0x242   :  { %592 = vmatprep.subr.mxu1 %v2775_v22 }
 0x243   :  { %593 = vmatpush1.msra.mxu1 %v2778_v23 }
 0x244   :  { %594 = vmatprep.subr.mxu1 %v2782_v24 }
 0x245   :  { %595 = vmatpush1.msra.mxu1 %v2787_v25 }
 0x246   :  { %596 = vmatprep.subr.mxu1 %v2791_v27 }
 0x247   :  { %597 = vmatpush1.msra.mxu1 %v2794_v28 }
 0x248   :  { %598 = vmatprep.subr.mxu1 %v2798_v29 }
 0x249   :  { %599 = vmatpush1.msra.mxu1 %v2803_v30 }
 0x24a   :  { %2190 = vmatmul.mubr.msk.f32.vlgmr.msra.gmra.mxu1 %vm360_vm1, %v565_v61  ;;  %708 = vmatprep.subr.mxu1 %v2747_v10 }
 0x24b   :  { %709 = vmatpush1.msra.mxu1 %v2749_v11  ;;  %756 = vmatprep.mubr.f32.mxu1 %v2667_v0 }
 0x24c   :  { %710 = vmatprep.subr.mxu1 %v2751_v12 }
 0x24d   :  { %711 = vmatpush1.msra.mxu1 %v2755_v14 }
 0x24e   :  { %712 = vmatprep.subr.mxu1 %v2759_v16 }
 0x24f   :  { %713 = vmatpush1.msra.mxu1 %v2762_v17 }
 0x250   :  { %714 = vmatprep.subr.mxu1 %v2766_v18 }
 0x251   :  { %715 = vmatpush1.msra.mxu1 %v2771_v20 }
 0x252   :  { %716 = vmatprep.subr.mxu1 %v2775_v22 }
 0x253   :  { %717 = vmatpush1.msra.mxu1 %v2778_v23 }
 0x254   :  { %718 = vmatprep.subr.mxu1 %v2782_v24 }
 0x255   :  { %719 = vmatpush1.msra.mxu1 %v2787_v25 }
 0x256   :  { %720 = vmatprep.subr.mxu1 %v2791_v27 }
 0x257   :  { %721 = vmatpush1.msra.mxu1 %v2794_v28 }
 0x258   :  { %722 = vmatprep.subr.mxu1 %v2798_v29 }
 0x259   :  { %723 = vmatpush1.msra.mxu1 %v2803_v30 }
 0x25a   :  { %910 = vmatprep.subr.mxu1 %v2747_v10 }
 0x2fa   :  { %v556_v3 = vpop.f32.mrf.mxu1 }
 0x2fb   :  { %v561_v4 = vadd.f32 %v556_v3, %v262_v1 }
 0x2fc   :  { %v558_v5 = vpop.f32.mrf.mxu1 }
 0x2fd   :  { %v2191_v6 = vmul.f32 -1.442695, %v561_v4  ;;  %v562_v7 = vadd.f32 %v558_v5, %v264_v2  ;;  %v102_v5 = vld [vmem:[#allocation2 + $0x20] sm:$0xff] }
 0x2fe   :  { %2171 = vmatmul.mubr.msk.f32.gmra.mxu0 %vm134_vm0, %v102_v5 }
 0x2ff   :  { %v2192_v8 = vmul.f32 -1.442695, %v562_v7  ;;  %2352 = vpow2.f32 %v2191_v6  ;;  %277 = vmatprep.mubr.f32.mxu0 %v2667_v0  ;;  %v103_v6 = vld [vmem:[#allocation2 + $0x28] sm:$0xff]  ;;  %v104_v7 = vld [vmem:[#allocation2 + $0x30] sm:$0xff] }
 0x301   :  { %2354 = vpow2.f32 %v2192_v8  ;;  %v105_v8 = vld [vmem:[#allocation2 + $0x38] sm:$0xff] }
 0x302   :  { %2172 = vmatmul.mubr.msk.f32.gmra.mxu0 %vm134_vm0, %v103_v6 }
 0x303   :  { %283 = vmatprep.mubr.f32.mxu0 %v2667_v0 }
 0x306   :  { %2173 = vmatmul.mubr.msk.f32.gmra.mxu0 %vm134_vm0, %v104_v7 }
 0x307   :  { %289 = vmatprep.mubr.f32.mxu0 %v2667_v0 }
 0x30a   :  { %v634_v19 = vpop.f32.mrf.mxu1  ;;  %2174 = vmatmul.mubr.msk.f32.gmra.mxu0 %vm134_vm0, %v105_v8 }
 0x30b   :  { %v639_v26 = vadd.f32 %v634_v19, %v268_v13  ;;  %295 = vmatprep.mubr.f32.mxu0 %v2667_v0 }
 0x30c   :  { %v636_v31 = vpop.f32.mrf.mxu1  ;;  %v2353_v34 = vpop.eup %2352 }
 0x30d   :  { %v2194_v37 = vmul.f32 -1.442695, %v639_v26  ;;  %v640_v40 = vadd.f32 %v636_v31, %v270_v21  ;;  %v647_v52 = vadd.f32 1.0, %v2353_v34  ;;  %v107_v21 = vld [vmem:[#allocation2 + $0x48] sm:$0xff]  ;;  %v108_v26 = vld [vmem:[#allocation2 + $0x50] sm:$0xff]  ;;  %v109_v31 = vld [vmem:[#allocation2 + $0x58] sm:$0xff] }
 0x30e   :  { %v2355_v42 = vpop.eup %2354  ;;  %2175 = vmatmul.mubr.msk.f32.gmra.mxu0 %vm134_vm0, %v106_v9 }
 0x30f   :  { %v648_v47 = vadd.f32 1.0, %v2355_v42  ;;  %v2195_v49 = vmul.f32 -1.442695, %v640_v40  ;;  %2356 = vpow2.f32 %v2194_v37  ;;  %301 = vmatprep.mubr.f32.mxu0 %v2667_v0 }
 0x311   :  { %2358 = vrcp.f32 %v648_v47 }
 0x312   :  { %2360 = vpow2.f32 %v2195_v49  ;;  %2176 = vmatmul.mubr.msk.f32.gmra.mxu0 %vm134_vm0, %v107_v21 }
 0x313   :  { %2362 = vrcp.f32 %v647_v52  ;;  %307 = vmatprep.mubr.f32.mxu0 %v2667_v0 }
 0x316   :  { %2177 = vmatmul.mubr.msk.f32.gmra.mxu0 %vm134_vm0, %v108_v26 }
 0x317   :  { %313 = vmatprep.mubr.f32.mxu0 %v2667_v0 }
 0x31a   :  { %2178 = vmatmul.mubr.msk.f32.gmra.mxu0 %vm134_vm0, %v109_v31 }
 0x31b   :  { %834 = vmatprep.mubr.f32.mxu0 %v2667_v0 }
 0x31c   :  { %v2357_v53 = vpop.eup %2356 }
 0x31d   :  { %v661_v61 = vadd.f32 1.0, %v2357_v53 }
 0x31e   :  { %v2359_v55 = vpop.eup %2358 }
 0x31f   :  { %v2361_v56 = vpop.eup %2360  ;;  %v653_v57 = vmul.f32 2.0, %v2359_v55 }
 0x320   :  { %v662_v58 = vadd.f32 1.0, %v2361_v56  ;;  %v2363_v60 = vpop.eup %2362 }
 0x321   :  { %v2193_v59 = vadd.f32 -1.0, %v653_v57  ;;  %v669_v13 = vmul.f32 %v2363_v60, %v2882_v51 }
 0x322   :  { %2364 = vrcp.f32 %v662_v58 }
 0x323   :  { %v670_v62 = vmul.f32 %v2363_v60, %v2193_v59  ;;  %2366 = vrcp.f32 %v661_v61 }
 0x325   :  { %672 = vrot.lane.b32.xlu0 %v670_v62, %s2668_s2 }
 0x32f   :  { %v2365_v63 = vpop.eup %2364 }
 0x330   :  { %v667_v1 = vmul.f32 2.0, %v2365_v63  ;;  %v2367_v3 = vpop.eup %2366 }
 0x331   :  { %v676_v51 = vmul.f32 %v2367_v3, %v2885_v54 }
 0x332   :  { %v2196_v2 = vadd.f32 -1.0, %v667_v1 }
 0x334   :  { %v677_v4 = vmul.f32 %v2367_v3, %v2196_v2 }
 0x336   :  { %679 = vrot.lane.b32.xlu1 %v677_v4, %s2668_s2 }
 0x397   :  { %v673_v15 = vpop.permute.xlu0 %672 }
 0x398   :  { %v2945_v19 = vadd.f32 %v673_v15, %v669_v13 }
 0x39a   :  { %2368 = vtanh.f32 %v2945_v19 }
 0x3a7   :  { %v2369_v34 = vpop.eup %2368 }
 0x3a8   :  { %v680_v37 = vpop.permute.xlu1 %679  ;;  %v684_v40 = vmul.f32 %v2369_v34, %v2359_v55 }
 0x3a9   :  { %v2955_v42 = vadd.f32 %v680_v37, %v676_v51 }
 0x3aa   :  { %688 = vrot.lane.b32.xlu0 %v684_v40, %s2668_s2 }
 0x3ab   :  { %2370 = vtanh.f32 %v2955_v42 }
 0x3b8   :  { %v2371_v47 = vpop.eup %2370 }
 0x3b9   :  { %v686_v49 = vmul.f32 %v2371_v47, %v2365_v63 }
 0x3bb   :  { %766 = vrot.lane.b32.xlu1 %v686_v49, %s2668_s2 }
 0x3be   :  { %v273_v53 = vpop.f32.mrf.mxu0 }
 0x3bf   :  { %v274_v2 = vadd.f32 %v273_v53, %v2864_v45 }
 0x3c0   :  { %v275_v55 = vpop.f32.mrf.mxu0 }
 0x3c1   :  { %v276_v5 = vadd.f32 %v275_v55, %v2870_v48 }
 0x3c2   :  { %v279_v56 = vpop.f32.mrf.mxu0 }
 0x3c3   :  { %v280_v34 = vadd.f32 %v279_v56, %v2864_v45 }
 0x3c4   :  { %v281_v57 = vpop.f32.mrf.mxu0 }
 0x3c5   :  { %v282_v37 = vadd.f32 %v281_v57, %v2870_v48 }
 0x3c6   :  { %v2996_v58 = vpop.f32.mrf.mxu0 }
 0x3c8   :  { %v2998_v59 = vpop.f32.mrf.mxu0 }
 0x3ca   :  { %v3000_v60 = vpop.f32.mrf.mxu0 }
 0x3cc   :  { %v3002_v61 = vpop.f32.mrf.mxu0 }
 0x3ce   :  { %v3004_v62 = vpop.f32.mrf.mxu0 }
 0x3d0   :  { %v3006_v63 = vpop.f32.mrf.mxu0 }
 0x3d2   :  { %v3008_v1 = vpop.f32.mrf.mxu0 }
 0x3d4   :  { %v3011_v3 = vpop.f32.mrf.mxu0 }
 0x3d6   :  { %v3014_v13 = vpop.f32.mrf.mxu0 }
 0x3d8   :  { %v3016_v21 = vpop.f32.mrf.mxu0 }
 0x3da   :  { %v3018_v26 = vpop.f32.mrf.mxu0 }
 0x3dc   :  { %v3020_v31 = vpop.f32.mrf.mxu0 }
 0x41c   :  { %v689_v52 = vpop.permute.xlu0 %688 }
 0x41d   :  { %2197 = vmatmul.mubr.msk.f32.vlgmr.msra.gmra.mxu1 %vm360_vm1, %v689_v52 }
 0x41e   :  { %911 = vmatpush1.msra.mxu1 %v2749_v11  ;;  %958 = vmatprep.mubr.f32.mxu1 %v2667_v0 }
 0x41f   :  { %912 = vmatprep.subr.mxu1 %v2751_v12 }
 0x420   :  { %913 = vmatpush1.msra.mxu1 %v2755_v14 }
 0x421   :  { %914 = vmatprep.subr.mxu1 %v2759_v16 }
 0x422   :  { %915 = vmatpush1.msra.mxu1 %v2762_v17 }
 0x423   :  { %916 = vmatprep.subr.mxu1 %v2766_v18 }
 0x424   :  { %917 = vmatpush1.msra.mxu1 %v2771_v20 }
 0x425   :  { %918 = vmatprep.subr.mxu1 %v2775_v22 }
 0x426   :  { %919 = vmatpush1.msra.mxu1 %v2778_v23 }
 0x427   :  { %920 = vmatprep.subr.mxu1 %v2782_v24 }
 0x428   :  { %921 = vmatpush1.msra.mxu1 %v2787_v25 }
 0x429   :  { %922 = vmatprep.subr.mxu1 %v2791_v27 }
 0x42a   :  { %923 = vmatpush1.msra.mxu1 %v2794_v28 }
 0x42b   :  { %924 = vmatprep.subr.mxu1 %v2798_v29 }
 0x42c   :  { %925 = vmatpush1.msra.mxu1 %v2803_v30 }
 0x42d   :  { %v767_v54 = vpop.permute.xlu1 %766  ;;  %1112 = vmatprep.subr.mxu1 %v2747_v10 }
 0x42e   :  { %2198 = vmatmul.mubr.msk.f32.vlgmr.msra.gmra.mxu0 %vm360_vm1, %v767_v54 }
 0x42f   :  { %989 = vmatpush1.msra.mxu0 %v2749_v11  ;;  %1036 = vmatprep.mubr.f32.mxu0 %v2667_v0 }
 0x430   :  { %990 = vmatprep.subr.mxu0 %v2751_v12 }
 0x431   :  { %991 = vmatpush1.msra.mxu0 %v2755_v14 }
 0x432   :  { %992 = vmatprep.subr.mxu0 %v2759_v16 }
 0x433   :  { %993 = vmatpush1.msra.mxu0 %v2762_v17 }
 0x434   :  { %994 = vmatprep.subr.mxu0 %v2766_v18 }
 0x435   :  { %995 = vmatpush1.msra.mxu0 %v2771_v20 }
 0x436   :  { %996 = vmatprep.subr.mxu0 %v2775_v22 }
 0x437   :  { %997 = vmatpush1.msra.mxu0 %v2778_v23 }
 0x438   :  { %998 = vmatprep.subr.mxu0 %v2782_v24 }
 0x439   :  { %999 = vmatpush1.msra.mxu0 %v2787_v25 }
 0x43a   :  { %1000 = vmatprep.subr.mxu0 %v2791_v27 }
 0x43b   :  { %1001 = vmatpush1.msra.mxu0 %v2794_v28 }
 0x43c   :  { %1002 = vmatprep.subr.mxu0 %v2798_v29 }
 0x43d   :  { %1003 = vmatpush1.msra.mxu0 %v2803_v30 }
 0x43e   :  { %1190 = vmatprep.subr.mxu0 %v2747_v10 }
 0x4dd   :  { %v758_v4 = vpop.f32.mrf.mxu1 }
 0x4de   :  { %v763_v6 = vadd.f32 %v758_v4, %v274_v2 }
 0x4df   :  { %v760_v7 = vpop.f32.mrf.mxu1 }
 0x4e0   :  { %v2199_v8 = vmul.f32 -1.442695, %v763_v6  ;;  %v764_v9 = vadd.f32 %v760_v7, %v276_v5 }
 0x4e2   :  { %v2200_v15 = vmul.f32 -1.442695, %v764_v9  ;;  %2372 = vpow2.f32 %v2199_v8 }
 0x4e4   :  { %2374 = vpow2.f32 %v2200_v15 }
 0x4ee   :  { %v836_v51 = vpop.f32.mrf.mxu0 }
 0x4ef   :  { %v841_v40 = vadd.f32 %v836_v51, %v280_v34  ;;  %v2373_v47 = vpop.eup %2372 }
 0x4f0   :  { %v838_v49 = vpop.f32.mrf.mxu0  ;;  %v849_v4 = vadd.f32 1.0, %v2373_v47 }
 0x4f1   :  { %v2375_v52 = vpop.eup %2374  ;;  %v2202_v54 = vmul.f32 -1.442695, %v841_v40  ;;  %v842_v53 = vadd.f32 %v838_v49, %v282_v37 }
 0x4f2   :  { %v850_v55 = vadd.f32 1.0, %v2375_v52 }
 0x4f3   :  { %2376 = vpow2.f32 %v2202_v54  ;;  %v2203_v2 = vmul.f32 -1.442695, %v842_v53 }
 0x4f4   :  { %2378 = vrcp.f32 %v850_v55 }
 0x4f5   :  { %2380 = vpow2.f32 %v2203_v2 }
 0x4f6   :  { %2382 = vrcp.f32 %v849_v4 }
 0x500   :  { %v2377_v5 = vpop.eup %2376 }
 0x501   :  { %v2379_v6 = vpop.eup %2378  ;;  %v863_v15 = vadd.f32 1.0, %v2377_v5 }
 0x502   :  { %v2381_v7 = vpop.eup %2380  ;;  %v855_v56 = vmul.f32 2.0, %v2379_v6 }
 0x503   :  { %v864_v8 = vadd.f32 1.0, %v2381_v7  ;;  %v2383_v57 = vpop.eup %2382 }
 0x504   :  { %v2201_v9 = vadd.f32 -1.0, %v855_v56  ;;  %v871_v52 = vmul.f32 %v2383_v57, %v2945_v19 }
 0x505   :  { %2384 = vrcp.f32 %v864_v8 }
 0x506   :  { %v872_v34 = vmul.f32 %v2383_v57, %v2201_v9  ;;  %2386 = vrcp.f32 %v863_v15  ;;  %v288_v57 = vadd.f32 %v2998_v59, %v2870_v48 }
 0x508   :  { %874 = vrot.lane.b32.xlu0 %v872_v34, %s2668_s2 }
 0x512   :  { %v2385_v51 = vpop.eup %2384 }
 0x513   :  { %v869_v37 = vmul.f32 2.0, %v2385_v51  ;;  %v2387_v47 = vpop.eup %2386 }
 0x514   :  { %v878_v2 = vmul.f32 %v2387_v47, %v2955_v42 }
 0x515   :  { %v2204_v40 = vadd.f32 -1.0, %v869_v37 }
 0x517   :  { %v879_v49 = vmul.f32 %v2387_v47, %v2204_v40  ;;  %v292_v47 = vadd.f32 %v3000_v60, %v2864_v45 }
 0x519   :  { %881 = vrot.lane.b32.xlu1 %v879_v49, %s2668_s2 }
 0x57a   :  { %v875_v54 = vpop.permute.xlu0 %874 }
 0x57b   :  { %v3027_v53 = vadd.f32 %v875_v54, %v871_v52 }
 0x57d   :  { %2388 = vtanh.f32 %v3027_v53 }
 0x58a   :  { %v2389_v55 = vpop.eup %2388 }
 0x58b   :  { %v882_v4 = vpop.permute.xlu1 %881  ;;  %v886_v5 = vmul.f32 %v2389_v55, %v2379_v6  ;;  %v286_v6 = vadd.f32 %v2996_v58, %v2864_v45 }
 0x58c   :  { %v3031_v7 = vadd.f32 %v882_v4, %v878_v2 }
 0x58d   :  { %890 = vrot.lane.b32.xlu0 %v886_v5, %s2668_s2 }
 0x58e   :  { %2390 = vtanh.f32 %v3031_v7 }
 0x59b   :  { %v2391_v56 = vpop.eup %2390 }
 0x59c   :  { %v888_v8 = vmul.f32 %v2391_v56, %v2385_v51 }
 0x59e   :  { %968 = vrot.lane.b32.xlu1 %v888_v8, %s2668_s2 }
 0x5ff   :  { %v891_v19 = vpop.permute.xlu0 %890 }
 0x600   :  { %2205 = vmatmul.mubr.msk.f32.vlgmr.msra.gmra.mxu1 %vm360_vm1, %v891_v19 }
 0x601   :  { %1113 = vmatpush1.msra.mxu1 %v2749_v11  ;;  %1160 = vmatprep.mubr.f32.mxu1 %v2667_v0 }
 0x602   :  { %1114 = vmatprep.subr.mxu1 %v2751_v12 }
 0x603   :  { %1115 = vmatpush1.msra.mxu1 %v2755_v14 }
 0x604   :  { %1116 = vmatprep.subr.mxu1 %v2759_v16 }
 0x605   :  { %1117 = vmatpush1.msra.mxu1 %v2762_v17 }
 0x606   :  { %1118 = vmatprep.subr.mxu1 %v2766_v18 }
 0x607   :  { %1119 = vmatpush1.msra.mxu1 %v2771_v20 }
 0x608   :  { %1120 = vmatprep.subr.mxu1 %v2775_v22 }
 0x609   :  { %1121 = vmatpush1.msra.mxu1 %v2778_v23 }
 0x60a   :  { %1122 = vmatprep.subr.mxu1 %v2782_v24 }
 0x60b   :  { %1123 = vmatpush1.msra.mxu1 %v2787_v25 }
 0x60c   :  { %1124 = vmatprep.subr.mxu1 %v2791_v27 }
 0x60d   :  { %1125 = vmatpush1.msra.mxu1 %v2794_v28 }
 0x60e   :  { %1126 = vmatprep.subr.mxu1 %v2798_v29 }
 0x60f   :  { %1127 = vmatpush1.msra.mxu1 %v2803_v30 }
 0x610   :  { %v969_v42 = vpop.permute.xlu1 %968  ;;  %1314 = vmatprep.subr.mxu1 %v2747_v10 }
 0x611   :  { %2206 = vmatmul.mubr.msk.f32.vlgmr.msra.gmra.mxu0 %vm360_vm1, %v969_v42 }
 0x612   :  { %1191 = vmatpush1.msra.mxu0 %v2749_v11  ;;  %1238 = vmatprep.mubr.f32.mxu0 %v2667_v0 }
 0x613   :  { %1192 = vmatprep.subr.mxu0 %v2751_v12 }
 0x614   :  { %1193 = vmatpush1.msra.mxu0 %v2755_v14 }
 0x615   :  { %1194 = vmatprep.subr.mxu0 %v2759_v16 }
 0x616   :  { %1195 = vmatpush1.msra.mxu0 %v2762_v17 }
 0x617   :  { %1196 = vmatprep.subr.mxu0 %v2766_v18 }
 0x618   :  { %1197 = vmatpush1.msra.mxu0 %v2771_v20 }
 0x619   :  { %1198 = vmatprep.subr.mxu0 %v2775_v22 }
 0x61a   :  { %1199 = vmatpush1.msra.mxu0 %v2778_v23 }
 0x61b   :  { %1200 = vmatprep.subr.mxu0 %v2782_v24 }
 0x61c   :  { %1201 = vmatpush1.msra.mxu0 %v2787_v25 }
 0x61d   :  { %1202 = vmatprep.subr.mxu0 %v2791_v27 }
 0x61e   :  { %1203 = vmatpush1.msra.mxu0 %v2794_v28 }
 0x61f   :  { %1204 = vmatprep.subr.mxu0 %v2798_v29 }
 0x620   :  { %1205 = vmatpush1.msra.mxu0 %v2803_v30 }
 0x621   :  { %1392 = vmatprep.subr.mxu0 %v2747_v10  ;;  %v294_v10 = vadd.f32 %v3002_v61, %v2870_v48 }
 0x6c0   :  { %v960_v9 = vpop.f32.mrf.mxu1 }
 0x6c1   :  { %v965_v15 = vadd.f32 %v960_v9, %v286_v6 }
 0x6c2   :  { %v962_v34 = vpop.f32.mrf.mxu1 }
 0x6c3   :  { %v2207_v51 = vmul.f32 -1.442695, %v965_v15  ;;  %v966_v37 = vadd.f32 %v962_v34, %v288_v57 }
 0x6c5   :  { %v2208_v40 = vmul.f32 -1.442695, %v966_v37  ;;  %2392 = vpow2.f32 %v2207_v51 }
 0x6c7   :  { %2394 = vpow2.f32 %v2208_v40 }
 0x6d1   :  { %v1038_v49 = vpop.f32.mrf.mxu0 }
 0x6d2   :  { %v1043_v52 = vadd.f32 %v1038_v49, %v292_v47  ;;  %v2393_v58 = vpop.eup %2392 }
 0x6d3   :  { %v1040_v54 = vpop.f32.mrf.mxu0  ;;  %v1051_v56 = vadd.f32 1.0, %v2393_v58 }
 0x6d4   :  { %v2395_v55 = vpop.eup %2394  ;;  %v2210_v2 = vmul.f32 -1.442695, %v1043_v52  ;;  %v1044_v59 = vadd.f32 %v1040_v54, %v294_v10 }
 0x6d5   :  { %v1052_v4 = vadd.f32 1.0, %v2395_v55 }
 0x6d6   :  { %2396 = vpow2.f32 %v2210_v2  ;;  %v2211_v5 = vmul.f32 -1.442695, %v1044_v59 }
 0x6d7   :  { %2398 = vrcp.f32 %v1052_v4 }
 0x6d8   :  { %2400 = vpow2.f32 %v2211_v5 }
 0x6d9   :  { %2402 = vrcp.f32 %v1051_v56  ;;  %v3129_v56 = vld [vmem:[#allocation7 + $0x48] sm:$0xff] }
 0x6e3   :  { %v2397_v8 = vpop.eup %2396 }
 0x6e4   :  { %v2399_v19 = vpop.eup %2398  ;;  %v1065_v57 = vadd.f32 1.0, %v2397_v8 }
 0x6e5   :  { %v2401_v60 = vpop.eup %2400  ;;  %v1057_v42 = vmul.f32 2.0, %v2399_v19 }
 0x6e6   :  { %v1066_v6 = vadd.f32 1.0, %v2401_v60  ;;  %v2403_v61 = vpop.eup %2402 }
 0x6e7   :  { %v2209_v9 = vadd.f32 -1.0, %v1057_v42  ;;  %v1073_v49 = vmul.f32 %v2403_v61, %v3027_v53 }
 0x6e8   :  { %2404 = vrcp.f32 %v1066_v6 }
 0x6e9   :  { %v1074_v15 = vmul.f32 %v2403_v61, %v2209_v9  ;;  %2406 = vrcp.f32 %v1065_v57 }
 0x6eb   :  { %1076 = vrot.lane.b32.xlu0 %v1074_v15, %s2668_s2 }
 0x6f5   :  { %v2405_v34 = vpop.eup %2404 }
 0x6f6   :  { %v1071_v51 = vmul.f32 2.0, %v2405_v34  ;;  %v2407_v40 = vpop.eup %2406 }
 0x6f7   :  { %v1080_v54 = vmul.f32 %v2407_v40, %v3031_v7  ;;  %v3126_v7 = vld [vmem:[#allocation7 + $0x50] sm:$0xff] }
 0x6f8   :  { %v2212_v37 = vadd.f32 -1.0, %v1071_v51 }
 0x6fa   :  { %v1081_v47 = vmul.f32 %v2407_v40, %v2212_v37 }
 0x6fc   :  { %1083 = vrot.lane.b32.xlu1 %v1081_v47, %s2668_s2 }
 0x75d   :  { %v1077_v10 = vpop.permute.xlu0 %1076 }
 0x75e   :  { %v3083_v52 = vadd.f32 %v1077_v10, %v1073_v49 }
 0x760   :  { %2408 = vtanh.f32 %v3083_v52 }
 0x76d   :  { %v2409_v58 = vpop.eup %2408 }
 0x76e   :  { %v1084_v55 = vpop.permute.xlu1 %1083  ;;  %v1088_v2 = vmul.f32 %v2409_v58, %v2399_v19 }
 0x76f   :  { %v3087_v59 = vadd.f32 %v1084_v55, %v1080_v54 }
 0x770   :  { %1092 = vrot.lane.b32.xlu0 %v1088_v2, %s2668_s2 }
 0x771   :  { %2410 = vtanh.f32 %v3087_v59 }
 0x77e   :  { %v2411_v4 = vpop.eup %2410 }
 0x77f   :  { %v1090_v5 = vmul.f32 %v2411_v4, %v2405_v34 }
 0x781   :  { %1170 = vrot.lane.b32.xlu1 %v1090_v5, %s2668_s2 }
 0x7e2   :  { %v1093_v53 = vpop.permute.xlu0 %1092 }
 0x7e3   :  { %2213 = vmatmul.mubr.msk.f32.vlgmr.msra.gmra.mxu1 %vm360_vm1, %v1093_v53 }
 0x7e4   :  { %1315 = vmatpush1.msra.mxu1 %v2749_v11  ;;  %1362 = vmatprep.mubr.f32.mxu1 %v2667_v0 }
 0x7e5   :  { %1316 = vmatprep.subr.mxu1 %v2751_v12  ;;  %v3109_v12 = vld [vmem:[#allocation7 + $0x78] sm:$0xff] }
 0x7e6   :  { %1317 = vmatpush1.msra.mxu1 %v2755_v14  ;;  %v3113_v14 = vld [vmem:[#allocation7 + $0x70] sm:$0xff] }
 0x7e7   :  { %1318 = vmatprep.subr.mxu1 %v2759_v16  ;;  %v3117_v16 = vld [vmem:[#allocation7 + $0x68] sm:$0xff] }
 0x7e8   :  { %1319 = vmatpush1.msra.mxu1 %v2762_v17  ;;  %v3120_v17 = vld [vmem:[#allocation7 + $0x60] sm:$0xff] }
 0x7e9   :  { %1320 = vmatprep.subr.mxu1 %v2766_v18  ;;  %v3123_v18 = vld [vmem:[#allocation7 + $0x58] sm:$0xff] }
 0x7ea   :  { %1321 = vmatpush1.msra.mxu1 %v2771_v20 }
 0x7eb   :  { %1322 = vmatprep.subr.mxu1 %v2775_v22 }
 0x7ec   :  { %1323 = vmatpush1.msra.mxu1 %v2778_v23 }
 0x7ed   :  { %1324 = vmatprep.subr.mxu1 %v2782_v24 }
 0x7ee   :  { %1325 = vmatpush1.msra.mxu1 %v2787_v25 }
 0x7ef   :  { %1326 = vmatprep.subr.mxu1 %v2791_v27 }
 0x7f0   :  { %1327 = vmatpush1.msra.mxu1 %v2794_v28 }
 0x7f1   :  { %1328 = vmatprep.subr.mxu1 %v2798_v29 }
 0x7f2   :  { %1329 = vmatpush1.msra.mxu1 %v2803_v30 }
 0x7f3   :  { %v1171_v11 = vpop.permute.xlu1 %1170  ;;  %1516 = vmatprep.subr.mxu1 %v3109_v12 }
 0x7f4   :  { %2214 = vmatmul.mubr.msk.f32.vlgmr.msra.gmra.mxu0 %vm360_vm1, %v1171_v11 }
 0x7f5   :  { %1393 = vmatpush1.msra.mxu0 %v3113_v14  ;;  %1440 = vmatprep.mubr.f32.mxu0 %v2667_v0 }
 0x7f6   :  { %1394 = vmatprep.subr.mxu0 %v3117_v16 }
 0x7f7   :  { %1395 = vmatpush1.msra.mxu0 %v3120_v17 }
 0x7f8   :  { %1396 = vmatprep.subr.mxu0 %v3123_v18 }
 0x7f9   :  { %1397 = vmatpush1.msra.mxu0 %v3126_v7 }
 0x7fa   :  { %1398 = vmatprep.subr.mxu0 %v3129_v56 }
 0x7fb   :  { %1399 = vmatpush1.msra.mxu0 %v2771_v20  ;;  %v298_v20 = vadd.f32 %v3004_v62, %v2864_v45 }
 0x7fc   :  { %1400 = vmatprep.subr.mxu0 %v2775_v22 }
 0x7fd   :  { %1401 = vmatpush1.msra.mxu0 %v2778_v23  ;;  %v300_v23 = vadd.f32 %v3006_v63, %v2870_v48 }
 0x7fe   :  { %1402 = vmatprep.subr.mxu0 %v2782_v24 }
 0x7ff   :  { %1403 = vmatpush1.msra.mxu0 %v2787_v25 }
 0x800   :  { %1404 = vmatprep.subr.mxu0 %v2791_v27 }
 0x801   :  { %1405 = vmatpush1.msra.mxu0 %v2794_v28  ;;  %v304_v28 = vadd.f32 %v3008_v1, %v2864_v45 }
 0x802   :  { %1406 = vmatprep.subr.mxu0 %v2798_v29 }
 0x803   :  { %1407 = vmatpush1.msra.mxu0 %v2803_v30  ;;  %v306_v30 = vadd.f32 %v3011_v3, %v2870_v48 }
 0x804   :  { %1594 = vmatprep.subr.mxu0 %v3109_v12 }
 0x8a3   :  { %v1162_v22 = vpop.f32.mrf.mxu1 }
 0x8a4   :  { %v1167_v24 = vadd.f32 %v1162_v22, %v298_v20 }
 0x8a5   :  { %v1164_v8 = vpop.f32.mrf.mxu1 }
 0x8a6   :  { %v2215_v25 = vmul.f32 -1.442695, %v1167_v24  ;;  %v1168_v19 = vadd.f32 %v1164_v8, %v300_v23 }
 0x8a8   :  { %v2216_v27 = vmul.f32 -1.442695, %v1168_v19  ;;  %2412 = vpow2.f32 %v2215_v25 }
 0x8aa   :  { %2414 = vpow2.f32 %v2216_v27  ;;  %v3173_v27 = vld [vmem:[#allocation7 + $0x38] sm:$0xff] }
 0x8b4   :  { %v1240_v29 = vpop.f32.mrf.mxu0 }
 0x8b5   :  { %v1245_v60 = vadd.f32 %v1240_v29, %v304_v28  ;;  %v2413_v62 = vpop.eup %2412  ;;  %v3176_v28 = vld [vmem:[#allocation7 + $0x30] sm:$0xff]  ;;  %v3179_v29 = vld [vmem:[#allocation7 + $0x28] sm:$0xff] }
 0x8b6   :  { %v1242_v42 = vpop.f32.mrf.mxu0  ;;  %v1253_v15 = vadd.f32 1.0, %v2413_v62  ;;  %v3188_v62 = vld [vmem:[#allocation7 + $0x10] sm:$0xff] }
 0x8b7   :  { %v2415_v6 = vpop.eup %2414  ;;  %v2218_v9 = vmul.f32 -1.442695, %v1245_v60  ;;  %v1246_v63 = vadd.f32 %v1242_v42, %v306_v30  ;;  %v3182_v30 = vld [vmem:[#allocation7 + $0x20] sm:$0xff]  ;;  %v3185_v60 = vld [vmem:[#allocation7 + $0x18] sm:$0xff]  ;;  %v3191_v42 = vld [vmem:[#allocation7 + $0x8] sm:$0xff] }
 0x8b8   :  { %v1254_v61 = vadd.f32 1.0, %v2415_v6  ;;  %v3194_v6 = vld [vmem:[#allocation7] sm:$0xff] }
 0x8b9   :  { %2416 = vpow2.f32 %v2218_v9  ;;  %v2219_v57 = vmul.f32 -1.442695, %v1246_v63  ;;  %v310_v63 = vadd.f32 %v3014_v13, %v2864_v45 }
 0x8ba   :  { %2418 = vrcp.f32 %v1254_v61 }
 0x8bb   :  { %2420 = vpow2.f32 %v2219_v57  ;;  %v312_v57 = vadd.f32 %v3016_v21, %v2870_v48 }
 0x8bc   :  { %2422 = vrcp.f32 %v1253_v15 }
 0x8c6   :  { %v2417_v34 = vpop.eup %2416 }
 0x8c7   :  { %v2419_v51 = vpop.eup %2418  ;;  %v1267_v49 = vadd.f32 1.0, %v2417_v34 }
 0x8c8   :  { %v2421_v1 = vpop.eup %2420  ;;  %v1259_v37 = vmul.f32 2.0, %v2419_v51 }
 0x8c9   :  { %v1268_v40 = vadd.f32 1.0, %v2421_v1  ;;  %v2423_v3 = vpop.eup %2422 }
 0x8ca   :  { %v2217_v47 = vadd.f32 -1.0, %v1259_v37  ;;  %v1275_v5 = vmul.f32 %v2423_v3, %v3083_v52 }
 0x8cb   :  { %2424 = vrcp.f32 %v1268_v40  ;;  %v316_v40 = vadd.f32 %v3018_v26, %v2864_v45 }
 0x8cc   :  { %v1276_v10 = vmul.f32 %v2423_v3, %v2217_v47  ;;  %2426 = vrcp.f32 %v1267_v49 }
 0x8ce   :  { %1278 = vrot.lane.b32.xlu0 %v1276_v10, %s2668_s2 }
 0x8d8   :  { %v2425_v58 = vpop.eup %2424 }
 0x8d9   :  { %v1273_v54 = vmul.f32 2.0, %v2425_v58  ;;  %v2427_v2 = vpop.eup %2426 }
 0x8da   :  { %v1282_v22 = vmul.f32 %v2427_v2, %v3087_v59  ;;  %v3170_v59 = vld [vmem:[#allocation7 + $0x40] sm:$0xff] }
 0x8db   :  { %v2220_v55 = vadd.f32 -1.0, %v1273_v54 }
 0x8dd   :  { %v1283_v4 = vmul.f32 %v2427_v2, %v2220_v55 }
 0x8df   :  { %1285 = vrot.lane.b32.xlu1 %v1283_v4, %s2668_s2 }
 0x940   :  { %v1279_v53 = vpop.permute.xlu0 %1278 }
 0x941   :  { %v3153_v11 = vadd.f32 %v1279_v53, %v1275_v5 }
 0x943   :  { %2428 = vtanh.f32 %v3153_v11 }
 0x950   :  { %v2429_v20 = vpop.eup %2428 }
 0x951   :  { %v1286_v23 = vpop.permute.xlu1 %1285  ;;  %v1290_v24 = vmul.f32 %v2429_v20, %v2419_v51 }
 0x952   :  { %v3157_v8 = vadd.f32 %v1286_v23, %v1282_v22 }
 0x953   :  { %1294 = vrot.lane.b32.xlu0 %v1290_v24, %s2668_s2 }
 0x954   :  { %2430 = vtanh.f32 %v3157_v8 }
 0x961   :  { %v2431_v25 = vpop.eup %2430 }
 0x962   :  { %v1292_v19 = vmul.f32 %v2431_v25, %v2425_v58 }
 0x964   :  { %1372 = vrot.lane.b32.xlu1 %v1292_v19, %s2668_s2 }
 0x9c5   :  { %v1295_v52 = vpop.permute.xlu0 %1294 }
 0x9c6   :  { %2221 = vmatmul.mubr.msk.f32.vlgmr.msra.gmra.mxu1 %vm360_vm1, %v1295_v52 }
 0x9c7   :  { %1517 = vmatpush1.msra.mxu1 %v3113_v14  ;;  %1564 = vmatprep.mubr.f32.mxu1 %v2667_v0 }
 0x9c8   :  { %1518 = vmatprep.subr.mxu1 %v3117_v16 }
 0x9c9   :  { %1519 = vmatpush1.msra.mxu1 %v3120_v17 }
 0x9ca   :  { %1520 = vmatprep.subr.mxu1 %v3123_v18 }
 0x9cb   :  { %1521 = vmatpush1.msra.mxu1 %v3126_v7 }
 0x9cc   :  { %1522 = vmatprep.subr.mxu1 %v3129_v56 }
 0x9cd   :  { %1523 = vmatpush1.msra.mxu1 %v3170_v59 }
 0x9ce   :  { %1524 = vmatprep.subr.mxu1 %v3173_v27 }
 0x9cf   :  { %1525 = vmatpush1.msra.mxu1 %v3176_v28 }
 0x9d0   :  { %1526 = vmatprep.subr.mxu1 %v3179_v29 }
 0x9d1   :  { %1527 = vmatpush1.msra.mxu1 %v3182_v30 }
 0x9d2   :  { %1528 = vmatprep.subr.mxu1 %v3185_v60 }
 0x9d3   :  { %1529 = vmatpush1.msra.mxu1 %v3188_v62 }
 0x9d4   :  { %1530 = vmatprep.subr.mxu1 %v3191_v42 }
 0x9d5   :  { %1531 = vmatpush1.msra.mxu1 %v3194_v6 }
 0x9d6   :  { %v1373_v9 = vpop.permute.xlu1 %1372  ;;  %1718 = vmatprep.subr.mxu1 %v3109_v12 }
 0x9d7   :  { %2222 = vmatmul.mubr.msk.f32.vlgmr.msra.gmra.mxu0 %vm360_vm1, %v1373_v9 }
 0x9d8   :  { %1595 = vmatpush1.msra.mxu0 %v3113_v14  ;;  %1642 = vmatprep.mubr.f32.mxu0 %v2667_v0 }
 0x9d9   :  { %1596 = vmatprep.subr.mxu0 %v3117_v16 }
 0x9da   :  { %1597 = vmatpush1.msra.mxu0 %v3120_v17 }
 0x9db   :  { %1598 = vmatprep.subr.mxu0 %v3123_v18 }
 0x9dc   :  { %1599 = vmatpush1.msra.mxu0 %v3126_v7 }
 0x9dd   :  { %1600 = vmatprep.subr.mxu0 %v3129_v56 }
 0x9de   :  { %1601 = vmatpush1.msra.mxu0 %v3170_v59 }
 0x9df   :  { %1602 = vmatprep.subr.mxu0 %v3173_v27 }
 0x9e0   :  { %1603 = vmatpush1.msra.mxu0 %v3176_v28 }
 0x9e1   :  { %1604 = vmatprep.subr.mxu0 %v3179_v29 }
 0x9e2   :  { %1605 = vmatpush1.msra.mxu0 %v3182_v30 }
 0x9e3   :  { %1606 = vmatprep.subr.mxu0 %v3185_v60 }
 0x9e4   :  { %1607 = vmatpush1.msra.mxu0 %v3188_v62 }
 0x9e5   :  { %1608 = vmatprep.subr.mxu0 %v3191_v42 }
 0x9e6   :  { %1609 = vmatpush1.msra.mxu0 %v3194_v6 }
 0x9e7   :  { %1796 = vmatprep.subr.mxu0 %v3109_v12  ;;  %v318_v12 = vadd.f32 %v3020_v31, %v2870_v48 }
 0xa86   :  { %v1364_v61 = vpop.f32.mrf.mxu1 }
 0xa87   :  { %v1369_v15 = vadd.f32 %v1364_v61, %v310_v63 }
 0xa88   :  { %v1366_v34 = vpop.f32.mrf.mxu1 }
 0xa89   :  { %v2223_v51 = vmul.f32 -1.442695, %v1369_v15  ;;  %v1370_v1 = vadd.f32 %v1366_v34, %v312_v57 }
 0xa8b   :  { %v2224_v37 = vmul.f32 -1.442695, %v1370_v1  ;;  %2432 = vpow2.f32 %v2223_v51 }
 0xa8d   :  { %2434 = vpow2.f32 %v2224_v37 }
 0xa97   :  { %v1442_v47 = vpop.f32.mrf.mxu0 }
 0xa98   :  { %v1447_v3 = vadd.f32 %v1442_v47, %v316_v40  ;;  %v2433_v13 = vpop.eup %2432 }
 0xa99   :  { %v1444_v49 = vpop.f32.mrf.mxu0  ;;  %v1455_v2 = vadd.f32 1.0, %v2433_v13 }
 0xa9a   :  { %v2435_v10 = vpop.eup %2434  ;;  %v2226_v58 = vmul.f32 -1.442695, %v1447_v3  ;;  %v1448_v21 = vadd.f32 %v1444_v49, %v318_v12 }
 0xa9b   :  { %v1456_v54 = vadd.f32 1.0, %v2435_v10 }
 0xa9c   :  { %2436 = vpow2.f32 %v2226_v58  ;;  %v2227_v55 = vmul.f32 -1.442695, %v1448_v21 }
 0xa9d   :  { %2438 = vrcp.f32 %v1456_v54 }
 0xa9e   :  { %2440 = vpow2.f32 %v2227_v55 }
 0xa9f   :  { %2442 = vrcp.f32 %v1455_v2 }
 0xaa9   :  { %v2437_v4 = vpop.eup %2436 }
 0xaaa   :  { %v2439_v5 = vpop.eup %2438  ;;  %v1469_v23 = vadd.f32 1.0, %v2437_v4 }
 0xaab   :  { %v2441_v26 = vpop.eup %2440  ;;  %v1461_v53 = vmul.f32 2.0, %v2439_v5 }
 0xaac   :  { %v1470_v20 = vadd.f32 1.0, %v2441_v26  ;;  %v2443_v31 = vpop.eup %2442 }
 0xaad   :  { %v2225_v22 = vadd.f32 -1.0, %v1461_v53  ;;  %v1477_v61 = vmul.f32 %v2443_v31, %v3153_v11 }
 0xaae   :  { %2444 = vrcp.f32 %v1470_v20 }
 0xaaf   :  { %v1478_v24 = vmul.f32 %v2443_v31, %v2225_v22  ;;  %2446 = vrcp.f32 %v1469_v23  ;;  %v1906_v31 = vld [vmem:[#allocation8 + $0x38] sm:$0xff] }
 0xab1   :  { %1480 = vrot.lane.b32.xlu0 %v1478_v24, %s2668_s2 }
 0xabb   :  { %v2445_v25 = vpop.eup %2444 }
 0xabc   :  { %v1475_v19 = vmul.f32 2.0, %v2445_v25  ;;  %v2447_v9 = vpop.eup %2446 }
 0xabd   :  { %v1484_v51 = vmul.f32 %v2447_v9, %v3157_v8 }
 0xabe   :  { %v2228_v52 = vadd.f32 -1.0, %v1475_v19 }
 0xac0   :  { %v1485_v63 = vmul.f32 %v2447_v9, %v2228_v52 }
 0xac2   :  { %1487 = vrot.lane.b32.xlu1 %v1485_v63, %s2668_s2 }
 0xb23   :  { %v1481_v57 = vpop.permute.xlu0 %1480 }
 0xb24   :  { %v3227_v15 = vadd.f32 %v1481_v57, %v1477_v61 }
 0xb26   :  { %2448 = vtanh.f32 %v3227_v15 }
 0xb33   :  { %v2449_v34 = vpop.eup %2448 }
 0xb34   :  { %v1488_v1 = vpop.permute.xlu1 %1487  ;;  %v1492_v37 = vmul.f32 %v2449_v34, %v2439_v5 }
 0xb35   :  { %v3231_v40 = vadd.f32 %v1488_v1, %v1484_v51  ;;  %v1904_v1 = vld [vmem:[#allocation8 + $0x28] sm:$0xff] }
 0xb36   :  { %1496 = vrot.lane.b32.xlu0 %v1492_v37, %s2668_s2  ;;  %v1903_v37 = vld [vmem:[#allocation8 + $0x20] sm:$0xff] }
 0xb37   :  { %2450 = vtanh.f32 %v3231_v40 }
 0xb44   :  { %v2451_v47 = vpop.eup %2450 }
 0xb45   :  { %v1494_v12 = vmul.f32 %v2451_v47, %v2445_v25  ;;  %v1901_v47 = vld [vmem:[#allocation8 + $0x10] sm:$0xff] }
 0xb47   :  { %1574 = vrot.lane.b32.xlu1 %v1494_v12, %s2668_s2  ;;  %v1900_v12 = vld [vmem:[#allocation8 + $0x8] sm:$0xff] }
 0xba8   :  { %v1497_v11 = vpop.permute.xlu0 %1496 }
 0xba9   :  { %2229 = vmatmul.mubr.msk.f32.vlgmr.msra.gmra.mxu1 %vm360_vm1, %v1497_v11  ;;  %v1899_v11 = vld [vmem:[#allocation8] sm:$0xff] }
 0xbaa   :  { %1719 = vmatpush1.msra.mxu1 %v3113_v14  ;;  %1766 = vmatprep.mubr.f32.mxu1 %v2667_v0 }
 0xbab   :  { %1720 = vmatprep.subr.mxu1 %v3117_v16 }
 0xbac   :  { %1721 = vmatpush1.msra.mxu1 %v3120_v17 }
 0xbad   :  { %1722 = vmatprep.subr.mxu1 %v3123_v18 }
 0xbae   :  { %1723 = vmatpush1.msra.mxu1 %v3126_v7 }
 0xbaf   :  { %1724 = vmatprep.subr.mxu1 %v3129_v56 }
 0xbb0   :  { %1725 = vmatpush1.msra.mxu1 %v3170_v59 }
 0xbb1   :  { %1726 = vmatprep.subr.mxu1 %v3173_v27 }
 0xbb2   :  { %1727 = vmatpush1.msra.mxu1 %v3176_v28 }
 0xbb3   :  { %1728 = vmatprep.subr.mxu1 %v3179_v29 }
 0xbb4   :  { %1729 = vmatpush1.msra.mxu1 %v3182_v30 }
 0xbb5   :  { %1730 = vmatprep.subr.mxu1 %v3185_v60 }
 0xbb6   :  { %1731 = vmatpush1.msra.mxu1 %v3188_v62 }
 0xbb7   :  { %1732 = vmatprep.subr.mxu1 %v3191_v42 }
 0xbb8   :  { %1733 = vmatpush1.msra.mxu1 %v3194_v6 }
 0xbb9   :  { %v1575_v8 = vpop.permute.xlu1 %1574  ;;  %1943 = vmatprep.subr.mxu1 %v1906_v31 }
 0xbba   :  { %2230 = vmatmul.mubr.msk.f32.vlgmr.msra.gmra.mxu0 %vm360_vm1, %v1575_v8  ;;  %v2528_v8 = vld [vmem:[#allocation2 + $0x70] sm:$0xff] }
 0xbbb   :  { %1797 = vmatpush1.msra.mxu0 %v3113_v14  ;;  %1844 = vmatprep.mubr.f32.mxu0 %v2667_v0  ;;  %v322_v14 = vadd.f32 %v2843_v32, %v2864_v45 }
 0xbbc   :  { %1798 = vmatprep.subr.mxu0 %v3117_v16 }
 0xbbd   :  { %1799 = vmatpush1.msra.mxu0 %v3120_v17  ;;  %v324_v17 = vadd.f32 %v2845_v33, %v2870_v48 }
 0xbbe   :  { %1800 = vmatprep.subr.mxu0 %v3123_v18 }
 0xbbf   :  { %1801 = vmatpush1.msra.mxu0 %v3126_v7 }
 0xbc0   :  { %1802 = vmatprep.subr.mxu0 %v3129_v56 }
 0xbc1   :  { %1803 = vmatpush1.msra.mxu0 %v3170_v59 }
 0xbc2   :  { %1804 = vmatprep.subr.mxu0 %v3173_v27 }
 0xbc3   :  { %1805 = vmatpush1.msra.mxu0 %v3176_v28  ;;  %v328_v28 = vadd.f32 %v2849_v36, %v2864_v45 }
 0xbc4   :  { %1806 = vmatprep.subr.mxu0 %v3179_v29 }
 0xbc5   :  { %1807 = vmatpush1.msra.mxu0 %v3182_v30  ;;  %v330_v30 = vadd.f32 %v2851_v38, %v2870_v48 }
 0xbc6   :  { %1808 = vmatprep.subr.mxu0 %v3185_v60 }
 0xbc7   :  { %1809 = vmatpush1.msra.mxu0 %v3188_v62 }
 0xbc8   :  { %1810 = vmatprep.subr.mxu0 %v3191_v42 }
 0xbc9   :  { %1811 = vmatpush1.msra.mxu0 %v3194_v6 }
 0xc69   :  { %v1566_v16 = vpop.f32.mrf.mxu1 }
 0xc6a   :  { %v1571_v18 = vadd.f32 %v1566_v16, %v322_v14  ;;  %v2529_v14 = vld [vmem:[#allocation2 + $0x78] sm:$0xff] }
 0xc6b   :  { %v1568_v7 = vpop.f32.mrf.mxu1 }
 0xc6c   :  { %v2231_v56 = vmul.f32 -1.442695, %v1571_v18  ;;  %v1572_v59 = vadd.f32 %v1568_v7, %v324_v17  ;;  %v334_v17 = vadd.f32 %v2857_v41, %v2864_v45  ;;  %v336_v7 = vadd.f32 %v2860_v44, %v2870_v48 }
 0xc6e   :  { %v2232_v27 = vmul.f32 -1.442695, %v1572_v59  ;;  %2452 = vpow2.f32 %v2231_v56 }
 0xc70   :  { %2454 = vpow2.f32 %v2232_v27 }
 0xc7a   :  { %v1644_v29 = vpop.f32.mrf.mxu0 }
 0xc7b   :  { %v1649_v60 = vadd.f32 %v1644_v29, %v328_v28  ;;  %v2453_v32 = vpop.eup %2452 }
 0xc7c   :  { %v1646_v62 = vpop.f32.mrf.mxu0  ;;  %v1657_v49 = vadd.f32 1.0, %v2453_v32 }
 0xc7d   :  { %v2455_v42 = vpop.eup %2454  ;;  %v2234_v6 = vmul.f32 -1.442695, %v1649_v60  ;;  %v1650_v33 = vadd.f32 %v1646_v62, %v330_v30 }
 0xc7e   :  { %v1658_v3 = vadd.f32 1.0, %v2455_v42 }
 0xc7f   :  { %2456 = vpow2.f32 %v2234_v6  ;;  %v2235_v13 = vmul.f32 -1.442695, %v1650_v33 }
 0xc80   :  { %2458 = vrcp.f32 %v1658_v3 }
 0xc81   :  { %2460 = vpow2.f32 %v2235_v13 }
 0xc82   :  { %2462 = vrcp.f32 %v1657_v49 }
 0xc8c   :  { %v2457_v10 = vpop.eup %2456 }
 0xc8d   :  { %v2459_v58 = vpop.eup %2458  ;;  %v1671_v2 = vadd.f32 1.0, %v2457_v10 }
 0xc8e   :  { %v2461_v36 = vpop.eup %2460  ;;  %v1663_v21 = vmul.f32 2.0, %v2459_v58 }
 0xc8f   :  { %v1672_v54 = vadd.f32 1.0, %v2461_v36  ;;  %v2463_v38 = vpop.eup %2462 }
 0xc90   :  { %v2233_v55 = vadd.f32 -1.0, %v1663_v21  ;;  %v1679_v23 = vmul.f32 %v2463_v38, %v3227_v15  ;;  %v1905_v15 = vld [vmem:[#allocation8 + $0x30] sm:$0xff] }
 0xc91   :  { %2464 = vrcp.f32 %v1672_v54 }
 0xc92   :  { %v1680_v4 = vmul.f32 %v2463_v38, %v2233_v55  ;;  %2466 = vrcp.f32 %v1671_v2 }
 0xc94   :  { %1682 = vrot.lane.b32.xlu0 %v1680_v4, %s2668_s2 }
 0xc9e   :  { %v2465_v5 = vpop.eup %2464 }
 0xc9f   :  { %v1677_v26 = vmul.f32 2.0, %v2465_v5  ;;  %v2467_v20 = vpop.eup %2466 }
 0xca0   :  { %v1686_v52 = vmul.f32 %v2467_v20, %v3231_v40  ;;  %v1902_v40 = vld [vmem:[#allocation8 + $0x18] sm:$0xff] }
 0xca1   :  { %v2236_v53 = vadd.f32 -1.0, %v1677_v26 }
 0xca3   :  { %v1687_v22 = vmul.f32 %v2467_v20, %v2236_v53 }
 0xca5   :  { %1689 = vrot.lane.b32.xlu1 %v1687_v22, %s2668_s2 }
 0xd06   :  { %v1683_v24 = vpop.permute.xlu0 %1682 }
 0xd07   :  { %v3281_v25 = vadd.f32 %v1683_v24, %v1679_v23 }
 0xd09   :  { %2468 = vtanh.f32 %v3281_v25 }
 0xd16   :  { %v2469_v19 = vpop.eup %2468 }
 0xd17   :  { %v1690_v9 = vpop.permute.xlu1 %1689  ;;  %v1694_v63 = vmul.f32 %v2469_v19, %v2459_v58 }
 0xd18   :  { %v3285_v61 = vadd.f32 %v1690_v9, %v1686_v52 }
 0xd19   :  { %1698 = vrot.lane.b32.xlu0 %v1694_v63, %s2668_s2 }
 0xd1a   :  { %2470 = vtanh.f32 %v3285_v61 }
 0xd27   :  { %v2471_v57 = vpop.eup %2470 }
 0xd28   :  { %v1696_v34 = vmul.f32 %v2471_v57, %v2465_v5 }
 0xd2a   :  { %1776 = vrot.lane.b32.xlu1 %v1696_v34, %s2668_s2 }
 0xd8b   :  { %v1699_v51 = vpop.permute.xlu0 %1698 }
 0xd8c   :  { %2237 = vmatmul.mubr.msk.f32.vlgmr.msra.gmra.mxu1 %vm360_vm1, %v1699_v51 }
 0xd8d   :  { %1944 = vmatpush1.msra.mxu1 %v1905_v15  ;;  %1983 = vmatprep.mubr.f32.mxu1 %v2667_v0 }
 0xd8e   :  { %1945 = vmatprep.subr.mxu1 %v1904_v1 }
 0xd8f   :  { %1946 = vmatpush1.msra.mxu1 %v1903_v37 }
 0xd90   :  { %1947 = vmatprep.subr.mxu1 %v1902_v40 }
 0xd91   :  { %1948 = vmatpush1.msra.mxu1 %v1901_v47 }
 0xd92   :  { %1949 = vmatprep.subr.mxu1 %v1900_v12 }
 0xd93   :  { %1950 = vmatpush1.msra.mxu1 %v1899_v11 }
 0xd94   :  { %2245 = vmatmul.mubr.msk.f32.vlgmr.msra.gmra.mxu1 %vm134_vm0, %v2528_v8 }
 0xd95   :  { %1989 = vmatprep.mubr.f32.mxu1 %v2667_v0  ;;  %v1907_v0 = vld [vmem:[%s3354_s5] sm:$0x3] }
 0xd96   :  { %v1912_v30 = vrot.slane %v1907_v0, %v126_v39  ;;  %v1916_v41 = vrot.slane %v1907_v0, %v130_v43  ;;  %v340_v39 = vadd.f32 %v2866_v46, %v2864_v45  ;;  %v342_v43 = vadd.f32 %v2873_v50, %v2870_v48  ;;  %v2062_v0 = vld [vmem:[#allocation10 + $0x70] sm:$0xff] }
 0xd98   :  { %2246 = vmatmul.mubr.msk.f32.gmra.mxu1 %vm134_vm0, %v2529_v14 }
 0xd9c   :  { %v1777_v16 = vpop.permute.xlu1 %1776 }
 0xd9d   :  { %2238 = vmatmul.mubr.msk.f32.vlgmr.msra.gmra.mxu0 %vm360_vm1, %v1777_v16 }
 0xe4c   :  { %v1768_v18 = vpop.f32.mrf.mxu1 }
 0xe4d   :  { %v1773_v56 = vadd.f32 %v1768_v18, %v334_v17 }
 0xe4e   :  { %v1770_v59 = vpop.f32.mrf.mxu1 }
 0xe4f   :  { %v2239_v27 = vmul.f32 -1.442695, %v1773_v56  ;;  %v1774_v28 = vadd.f32 %v1770_v59, %v336_v7 }
 0xe51   :  { %v2240_v29 = vmul.f32 -1.442695, %v1774_v28  ;;  %2472 = vpow2.f32 %v2239_v27  ;;  %v2063_v28 = vld [vmem:[#allocation10 + $0x78] sm:$0xff] }
 0xe52   :  { %2272 = vmatprep.subr.mxu0 %v2063_v28 }
 0xe53   :  { %2474 = vpow2.f32 %v2240_v29  ;;  %2273 = vmatpush3.msra.mxu0 %v2063_v28 }
 0xe54   :  { %v1985_v60 = vpop.f32.mrf.mxu1  ;;  %2274 = vmatprep.subr.mxu0 %v2062_v0 }
 0xe55   :  { %v1986_v32 = vadd.f32 %v1985_v60, %v1912_v30  ;;  %2275 = vmatpush3.msra.mxu0 %v2062_v0  ;;  %v2059_v60 = vld [vmem:[#allocation10 + $0x58] sm:$0xff] }
 0xe56   :  { %v1987_v44 = vpop.f32.mrf.mxu1 }
 0xe57   :  { %v2247_v62 = vmul.f32 -1.442695, %v1986_v32  ;;  %v1988_v42 = vadd.f32 %v1987_v44, %v1916_v41  ;;  %v2058_v32 = vld [vmem:[#allocation10 + $0x50] sm:$0xff]  ;;  %v2057_v44 = vld [vmem:[#allocation10 + $0x48] sm:$0xff] }
 0xe58   :  { %v1991_v6 = vpop.f32.mrf.mxu1 }
 0xe59   :  { %2476 = vpow2.f32 %v2247_v62  ;;  %v2248_v33 = vmul.f32 -1.442695, %v1988_v42  ;;  %v1992_v3 = vadd.f32 %v1991_v6, %v1912_v30  ;;  %v2061_v30 = vld [vmem:[#allocation10 + $0x68] sm:$0xff]  ;;  %v2056_v62 = vld [vmem:[#allocation10 + $0x40] sm:$0xff]  ;;  %v2055_v42 = vld [vmem:[#allocation10 + $0x38] sm:$0xff] }
 0xe5a   :  { %v1993_v13 = vpop.f32.mrf.mxu1  ;;  %2276 = vmatprep.subr.mxu0 %v2061_v30  ;;  %v2054_v6 = vld [vmem:[#allocation10 + $0x30] sm:$0xff] }
 0xe5b   :  { %2478 = vpow2.f32 %v2248_v33  ;;  %v2249_v49 = vmul.f32 -1.442695, %v1992_v3  ;;  %v1994_v10 = vadd.f32 %v1993_v13, %v1916_v41  ;;  %v2060_v41 = vld [vmem:[#allocation10 + $0x60] sm:$0xff]  ;;  %2277 = vmatpush3.msra.mxu0 %v2061_v30  ;;  %v2053_v33 = vld [vmem:[#allocation10 + $0x28] sm:$0xff]  ;;  %v2051_v13 = vld [vmem:[#allocation10 + $0x18] sm:$0xff] }
 0xe5c   :  { %2278 = vmatprep.subr.mxu0 %v2060_v41  ;;  %v2052_v3 = vld [vmem:[#allocation10 + $0x20] sm:$0xff] }
 0xe5d   :  { %2480 = vpow2.f32 %v2249_v49  ;;  %v2250_v58 = vmul.f32 -1.442695, %v1994_v10  ;;  %v1846_v35 = vpop.f32.mrf.mxu0  ;;  %2279 = vmatpush3.msra.mxu0 %v2060_v41  ;;  %v2050_v49 = vld [vmem:[#allocation10 + $0x10] sm:$0xff] }
 0xe5e   :  { %v1851_v36 = vadd.f32 %v1846_v35, %v340_v39  ;;  %v2473_v21 = vpop.eup %2472  ;;  %2280 = vmatprep.subr.mxu0 %v2059_v60 }
 0xe5f   :  { %2482 = vpow2.f32 %v2250_v58  ;;  %v1848_v54 = vpop.f32.mrf.mxu0  ;;  %v1859_v26 = vadd.f32 1.0, %v2473_v21  ;;  %2281 = vmatpush3.msra.mxu0 %v2059_v60  ;;  %v2049_v21 = vld [vmem:[#allocation10 + $0x8] sm:$0xff] }
 0xe60   :  { %v2475_v55 = vpop.eup %2474  ;;  %v2242_v38 = vmul.f32 -1.442695, %v1851_v36  ;;  %v1852_v2 = vadd.f32 %v1848_v54, %v342_v43  ;;  %2282 = vmatprep.subr.mxu0 %v2058_v32  ;;  %v2048_v54 = vld [vmem:[#allocation10] sm:$0xff] }
 0xe61   :  { %v1860_v4 = vadd.f32 1.0, %v2475_v55  ;;  %2283 = vmatpush3.msra.mxu0 %v2058_v32 }
 0xe62   :  { %2484 = vpow2.f32 %v2242_v38  ;;  %v2243_v5 = vmul.f32 -1.442695, %v1852_v2  ;;  %2284 = vmatprep.subr.mxu0 %v2057_v44 }
 0xe63   :  { %2486 = vrcp.f32 %v1860_v4  ;;  %2285 = vmatpush3.msra.mxu0 %v2057_v44 }
 0xe64   :  { %2488 = vpow2.f32 %v2243_v5  ;;  %2286 = vmatprep.subr.mxu0 %v2056_v62 }
 0xe65   :  { %2490 = vrcp.f32 %v1859_v26  ;;  %2287 = vmatpush3.msra.mxu0 %v2056_v62 }
 0xe66   :  { %v2477_v45 = vpop.eup %2476  ;;  %2288 = vmatprep.subr.mxu0 %v2055_v42 }
 0xe67   :  { %v2008_v53 = vadd.f32 1.0, %v2477_v45  ;;  %2289 = vmatpush3.msra.mxu0 %v2055_v42 }
 0xe68   :  { %v2479_v46 = vpop.eup %2478  ;;  %2290 = vmatprep.subr.mxu0 %v2054_v6 }
 0xe69   :  { %v2009_v20 = vadd.f32 1.0, %v2479_v46  ;;  %2291 = vmatpush3.msra.mxu0 %v2054_v6 }
 0xe6a   :  { %v2481_v22 = vpop.eup %2480  ;;  %2292 = vmatprep.subr.mxu0 %v2053_v33 }
 0xe6b   :  { %2492 = vrcp.f32 %v2009_v20  ;;  %v2010_v50 = vadd.f32 1.0, %v2481_v22  ;;  %2293 = vmatpush3.msra.mxu0 %v2053_v33 }
 0xe6c   :  { %v2483_v48 = vpop.eup %2482  ;;  %2494 = vrcp.f32 %v2008_v53  ;;  %2294 = vmatprep.subr.mxu0 %v2052_v3 }
 0xe6d   :  { %v2011_v31 = vadd.f32 1.0, %v2483_v48  ;;  %2295 = vmatpush3.msra.mxu0 %v2052_v3 }
 0xe6e   :  { %2296 = vmatprep.subr.mxu0 %v2051_v13 }
 0xe6f   :  { %v2485_v23 = vpop.eup %2484  ;;  %2496 = vrcp.f32 %v2011_v31  ;;  %2297 = vmatpush3.msra.mxu0 %v2051_v13 }
 0xe70   :  { %v3311_v24 = vpop.eup %2486  ;;  %2498 = vrcp.f32 %v2010_v50  ;;  %v1873_v34 = vadd.f32 1.0, %v2485_v23  ;;  %2298 = vmatprep.subr.mxu0 %v2050_v49  ;;  %v2253_v50 = vld [vmem:[%s3356_s7] ss:$0 sm:$0xff] }
 0xe71   :  { %v2489_v19 = vpop.eup %2488  ;;  %v1865_v52 = vmul.f32 2.0, %v3311_v24  ;;  %2299 = vmatpush3.msra.mxu0 %v2050_v49 }
 0xe72   :  { %v1874_v9 = vadd.f32 1.0, %v2489_v19  ;;  %v3314_v57 = vpop.eup %2490  ;;  %2300 = vmatprep.subr.mxu0 %v2049_v21 }
 0xe73   :  { %v2241_v63 = vadd.f32 -1.0, %v1865_v52  ;;  %v1881_v39 = vmul.f32 %v3314_v57, %v3281_v25  ;;  %2301 = vmatpush3.msra.mxu0 %v2049_v21 }
 0xe74   :  { %2500 = vrcp.f32 %v1874_v9  ;;  %2302 = vmatprep.subr.mxu0 %v2048_v54 }
 0xe75   :  { %v1882_v15 = vmul.f32 %v3314_v57, %v2241_v63  ;;  %2502 = vrcp.f32 %v1873_v34  ;;  %2303 = vmatpush3.msra.mxu0 %v2048_v54 }
 0xe77   :  { %1884 = vrot.lane.b32.xlu0 %v1882_v15, %s2668_s2 }
 0xe78   :  { %v3318_v51 = vpop.eup %2492 }
 0xe79   :  { %v2020_v1 = vmul.f32 2.0, %v3318_v51  ;;  %v2495_v37 = vpop.eup %2494 }
 0xe7b   :  { %v2251_v40 = vadd.f32 -1.0, %v2020_v1 }
 0xe7c   :  { %v3321_v47 = vpop.eup %2496 }
 0xe7d   :  { %v2024_v12 = vmul.f32 %v2495_v37, %v2251_v40  ;;  %v2021_v11 = vmul.f32 2.0, %v3321_v47  ;;  %v2499_v8 = vpop.eup %2498 }
 0xe7f   :  { %2504 = vtanh.f32 %v2024_v12  ;;  %v2252_v14 = vadd.f32 -1.0, %v2021_v11 }
 0xe81   :  { %v3324_v16 = vpop.eup %2500  ;;  %v2025_v17 = vmul.f32 %v2499_v8, %v2252_v14 }
 0xe82   :  { %v1879_v18 = vmul.f32 2.0, %v3324_v16  ;;  %v2503_v56 = vpop.eup %2502 }
 0xe83   :  { %2506 = vtanh.f32 %v2025_v17  ;;  %v1888_v35 = vmul.f32 %v2503_v56, %v3285_v61 }
 0xe84   :  { %v2244_v7 = vadd.f32 -1.0, %v1879_v18 }
 0xe86   :  { %v1889_v59 = vmul.f32 %v2503_v56, %v2244_v7 }
 0xe88   :  { %1891 = vrot.lane.b32.xlu1 %v1889_v59, %s2668_s2 }
 0xe8c   :  { %v2505_v27 = vpop.eup %2504 }
 0xe8d   :  { %2030 = vrot.lane.b32.xlu0 %v2505_v27, %s2668_s2 }
 0xe90   :  { %v2507_v29 = vpop.eup %2506 }
 0xe91   :  { %2032 = vrot.lane.b32.xlu1 %v2507_v29, %s2668_s2 }
 0xee9   :  { %v1885_v10 = vpop.permute.xlu0 %1884 }
 0xeea   :  { %v1887_v58 = vadd.f32 %v1885_v10, %v1881_v39 }
 0xeec   :  { %2508 = vtanh.f32 %v1887_v58 }
 0xef9   :  { %v2509_v55 = vpop.eup %2508 }
 0xefa   :  { %v1892_v43 = vpop.permute.xlu1 %1891  ;;  %v1896_v2 = vmul.f32 %v2509_v55, %v3311_v24 }
 0xefb   :  { %v1894_v36 = vadd.f32 %v1892_v43, %v1888_v35 }
 0xefd   :  { %2510 = vtanh.f32 %v1894_v36 }
 0xeff   :  { %v2031_v61 = vpop.permute.xlu0 %2030 }
 0xf00   :  { %v2036_v45 = vmul.f32 %v3318_v51, %v2031_v61 }
 0xf03   :  { %v2033_v5 = vpop.permute.xlu1 %2032 }
 0xf04   :  { %v2037_v46 = vmul.f32 %v3321_v47, %v2033_v5 }
 0xf0a   :  { %v2511_v38 = vpop.eup %2510 }
 0xf0b   :  { %v1898_v4 = vmul.f32 %v2511_v38, %v3324_v16 }
 0xf0d   :  { %v2327_v25 = vpack.i.bf16 %v1898_v4, %v1896_v2 }
 0xf0f   :  { %2328 = vrot.lane.b32.xlu0 %v2327_v25, %s2668_s2 }
 0xf81   :  { %v2329_v26 = vpop.permute.xlu0 %2328 }
 0xf82   :  { %v2331_v53 = vunpack.i.h.bf16 %v2329_v26  ;;  %v2330_v20 = vunpack.i.l.bf16 %v2329_v26 }
 0xf84   :  { %v2046_v22 = vsel %vm360_vm1, %v2330_v20, %v2036_v45  ;;  %v2047_v48 = vsel %vm360_vm1, %v2331_v53, %v2037_v46 }
 0xf85   :  { %2304 = vmatprep.mubr.f32.mxu0 %v2046_v22 }
 0xf86   :  { %2305 = vmatmul.mubr.f32.vlgmr.msra.gmra.mxu0 %v2047_v48 }
0x1046   :  { %v2306_v31 = vpop.f32.mrf.mxu0 }
0x1047   :  { %v2143_v23 = vadd.f32 %v2306_v31, %v2253_v50 }
0x1048   :  { %v2137_v24 = vpop.f32.mrf.mxu0 }
0x1049   :  { %2147 = vst [vmem:[#allocation11 + $0x8] sm:$0xff] %v2143_v23  ;;  %v2138_v19 = vadd.f32 %v2253_v50, %v2137_v24 }
0x104b   :  { %2146 = vst [vmem:[#allocation11] sm:$0xff] %v2138_v19 }
0x104c   :  { %2641 = shalt.err (!%p2638_p1)
}
0x104d   :  { %2159 = dma.vmem_to_hbm [thread:$0]  %s2154_s13, 256, %s3357_s8, [#allocation4], %s2663_s19, %s2663_s19, %s2664_s20  }
0x104e   :  { %2656 = dma.done.wait [#allocation4], 256  }
0x104f   :  { %2657 = vsyncadd [#allocation4], 4294967040 }
0x1050   :  { %2163 = vsyncpa [#allocation3], 1 }
0x1051   :  { %2164 = vsyncpa [#allocation6], 1 }
0x1052   :  { %2165 = vsyncpa [#allocation9], 1 }
0x1053   :  { %2166 = vsyncpa [#allocation4], 1 }

</bundles_post_ra>
